<compile_context>
chip_gen: v6e
topology: v6e:2x2x1
jax: 0.10.0
libtpu: 0.0.40
codegen_flags: <defaults>
</compile_context>

<pallas_src>
import string
from functools import partial

import jax
import jax.numpy as jnp
from jax.experimental import pallas as pl
from jax.experimental.pallas import tpu as pltpu

ALL_LETTERS = string.ascii_letters + " .,;'"
N_LETTERS = len(ALL_LETTERS)      # 57 one-hot letter features (input_size)
HIDDEN_SIZE = 32                  # small stand-in for n_hidden = 128 (3*H + O must fit 128 lanes)
OUTPUT_SIZE = 8                   # number of categories
BATCH = 2
LANE = 128                        # fused gate/output slab width (lane-dense)


def _gru_seq_kernel(x_ref, h0_ref, wx_ref, wh_ref, b_ref, lp_ref, h_ref,
                    *, hidden_size, output_size, chunk, seq_len, guard_tail):
    """One grid step = `chunk` timesteps of the recurrence, run as an unrolled in-kernel loop.

    x_ref : (chunk, B, N)   one-hot letters for this chunk
    h0_ref: (B, H)          externally supplied initial hidden
    wx_ref: (N, LANE)       fused x-side weights   [r | z | n | i2o | 0]
    wh_ref: (H, LANE)       fused h-side weights   [r | z | n | i2o | 0]
    b_ref : (2, LANE)       row0: fused bias slab; row1: b_hh_n at lanes [0,H)
    lp_ref: (chunk, B, LANE) per-step output slab; log-probs at lanes [3H, 3H+O)
    h_ref : (B, H)          final hidden; also the resident cross-chunk carry
    """
    H, O = hidden_size, output_size
    B = h0_ref.shape[0]
    c = pl.program_id(0)

    # Load the externally supplied hidden once; afterwards it lives in the resident
    # output block (constant index_map) across the "arbitrary" chunk axis.
    @pl.when(c == 0)
    def _():
        h_ref[...] = h0_ref[...]

    # ---- loop-invariant loads / broadcasts hoisted out of the unrolled loop ----------
    wx = wx_ref[...]                                            # (N, LANE)
    wh = wh_ref[...]                                            # (H, LANE)
    bias = jnp.broadcast_to(b_ref[0:1, :], (B, LANE))           # fused bias, (B, LANE)
    b_hn = jnp.broadcast_to(b_ref[1:2, 0:H], (B, H))            # b_hh_n at r's lane offset

    def step(t, h_prev):
        x = x_ref[t]                                            # (B, N)
        # One fused MXU pass: pre = x @ W_x + h_prev @ W_h + bias,
        # lanes laid out as [i_r | i_z | i_n | logits | 0-pad]  (width 128).
        pre = (jnp.dot(x, wx, preferred_element_type=jnp.float32)
               + jnp.dot(h_prev, wh, preferred_element_type=jnp.float32)
               + bias)

        # ---- nn.GRUCell(combined, hx=None): hx == 0, so h-side matmuls vanish -------
        r = jax.nn.sigmoid(pre[:, 0:H])
        z = jax.nn.sigmoid(pre[:, H:2 * H])
        n = jnp.tanh(pre[:, 2 * H:3 * H] + r * b_hn)
        h_new = (1.0 - z) * n                                   # + z * hx, and hx == 0

        # ---- nn.Linear(i2o) + nn.LogSoftmax(dim=1) -----------------------------------
        logits = pre[:, 3 * H:3 * H + O]
        m = jnp.max(logits, axis=1, keepdims=True)
        lse = m + jnp.log(jnp.sum(jnp.exp(logits - m), axis=1, keepdims=True))

        # Single unmasked 128-lane store per step: log-probs sit at their natural
        # lanes [3H, 3H+O); every other lane is finite don't-care (sliced off host-side).
        lp_ref[t] = pre - lse

        if guard_tail:  # only traced when T was padded up to a chunk multiple
            h_new = jnp.where(c * chunk + t < seq_len, h_new, h_prev)
        return h_new

    h_ref[...] = jax.lax.fori_loop(0, chunk, step, h_ref[...], unroll=True)


def gru_sequence_forward(x_seq, hidden, fused, chunk=None):
    """Run the whole character sequence in ONE pallas_call.

    Returns (log_probs[T, B, O], h_final[B, H]).  Each step reproduces the PyTorch
    module's forward(input_t, hidden_{t-1}); only the final hidden is materialised
    (intermediate hiddens stay in vregs/VMEM).
    """
    T, B, N = x_seq.shape
    H, O = fused["hidden_size"], fused["output_size"]
    if chunk is None:
        chunk = min(T, 64)                  # amortise the ~600-cycle/step grid overhead
    num_chunks = -(-T // chunk)
    Tp = num_chunks * chunk
    x_in = x_seq.astype(jnp.float32)
    guard_tail = Tp != T
    if guard_tail:
        x_in = jnp.pad(x_in, ((0, Tp - T), (0, 0), (0, 0)))

    lp_slab, h_final = pl.pallas_call(
        partial(_gru_seq_kernel, hidden_size=H, output_size=O,
                chunk=chunk, seq_len=T, guard_tail=guard_tail),
        out_shape=(jax.ShapeDtypeStruct((Tp, B, LANE), jnp.float32),   # per-step logp slab
                   jax.ShapeDtypeStruct((B, H), jnp.float32)),         # final hidden
        grid_spec=pltpu.PrefetchScalarGridSpec(
            num_scalar_prefetch=0,
            grid=(num_chunks,),
            in_specs=[
                pl.BlockSpec((chunk, B, N), lambda c: (c, 0, 0)),      # x chunk streamed in
                pl.BlockSpec((B, H), lambda c: (0, 0)),                # initial hidden
                pl.BlockSpec((N, LANE), lambda c: (0, 0)),             # W_x  (VMEM-resident, ~29 KB)
                pl.BlockSpec((H, LANE), lambda c: (0, 0)),             # W_h  (VMEM-resident, ~16 KB)
                pl.BlockSpec((2, LANE), lambda c: (0, 0)),             # fused biases
            ],
            out_specs=(pl.BlockSpec((chunk, B, LANE), lambda c: (c, 0, 0)),
                       pl.BlockSpec((B, H), lambda c: (0, 0))),        # resident carry / final h
        ),
        compiler_params=pltpu.CompilerParams(
            dimension_semantics=("arbitrary",)),                       # sequential recurrence
    )(x_in, hidden.astype(jnp.float32), fused["w_x"], fused["w_h"], fused["b"])

    log_probs = lp_slab[:T, :, 3 * H:3 * H + O]
    return log_probs, h_final


def gru_forward(x, hidden, fused):
    """Single-step forward matching the PyTorch module signature: (output, hidden)."""
    logp, h_new = gru_sequence_forward(x[None], hidden, fused)
    return logp[0], h_new


def init_params(key, input_size, hidden_size, output_size):
    """Raw parameters mirroring PyTorch GRUCell/Linear shapes & init scales,
    pre-transposed to [in_features, out_features]; gate order (r, z, n)."""
    c = input_size + hidden_size
    k = jax.random.split(key, 6)
    lim_cell = 1.0 / float(jnp.sqrt(hidden_size))
    lim_lin = 1.0 / float(jnp.sqrt(c))
    u = lambda kk, shape, lim: jax.random.uniform(kk, shape, jnp.float32, -lim, lim)
    return dict(
        input_size=input_size, hidden_size=hidden_size, output_size=output_size,
        w_ih_g=u(k[0], (3, c, hidden_size), lim_cell),
        w_hh_g=u(k[1], (3, hidden_size, hidden_size), lim_cell),  # dead vs zero hx (ref only)
        b_ih_g=u(k[2], (3, hidden_size), lim_cell),
        b_hh_g=u(k[3], (3, hidden_size), lim_cell),
        w_io_t=u(k[4], (c, output_size), lim_lin),
        b_io=u(k[5], (output_size,), lim_lin),
    )


def fuse_params(p):
    """Pack the 3 gates + i2o into one lane-dense (C,128) slab, split into the x-part /
    h-part (kernel never concatenates), and fold the zero-hx GRUCell bias algebra:
    b_hh_{r,z} fold into b_ih_{r,z}; b_hh_n stays separate (scaled by the reset gate)
    and is pre-shifted to lanes [0,H) so r * b_hh_n is lane-aligned with r."""
    N, H, O = p["input_size"], p["hidden_size"], p["output_size"]
    C = N + H
    assert 3 * H + O <= LANE, "fused slab must fit in 128 lanes"
    w_all = jnp.zeros((C, LANE), jnp.float32)
    w_all = w_all.at[:, 0:H].set(p["w_ih_g"][0])
    w_all = w_all.at[:, H:2 * H].set(p["w_ih_g"][1])
    w_all = w_all.at[:, 2 * H:3 * H].set(p["w_ih_g"][2])
    w_all = w_all.at[:, 3 * H:3 * H + O].set(p["w_io_t"])
    bias = jnp.zeros((2, LANE), jnp.float32)
    bias = bias.at[0, 0:H].set(p["b_ih_g"][0] + p["b_hh_g"][0])
    bias = bias.at[0, H:2 * H].set(p["b_ih_g"][1] + p["b_hh_g"][1])
    bias = bias.at[0, 2 * H:3 * H].set(p["b_ih_g"][2])
    bias = bias.at[0, 3 * H:3 * H + O].set(p["b_io"])
    bias = bias.at[1, 0:H].set(p["b_hh_g"][2])          # b_hh_n at the reset-gate lane offset
    return dict(hidden_size=H, output_size=O,
                w_x=w_all[:N], w_h=w_all[N:], b=bias)


def gru_forward_ref(x, hidden, p):
    """Pure-JAX single-step reference implementing the FULL PyTorch forward
    (including the w_hh matmuls against the zero hx that GRUCell(hx=None) uses),
    so it also verifies the algebraic simplification inside the kernel."""
    comb = jnp.concatenate([x, hidden], axis=1)
    h0 = jnp.zeros((x.shape[0], p["hidden_size"]), jnp.float32)   # hx=None -> zeros
    i_r = comb @ p["w_ih_g"][0] + p["b_ih_g"][0]
    i_z = comb @ p["w_ih_g"][1] + p["b_ih_g"][1]
    i_n = comb @ p["w_ih_g"][2] + p["b_ih_g"][2]
    h_r = h0 @ p["w_hh_g"][0] + p["b_hh_g"][0]
    h_z = h0 @ p["w_hh_g"][1] + p["b_hh_g"][1]
    h_n = h0 @ p["w_hh_g"][2] + p["b_hh_g"][2]
    r = jax.nn.sigmoid(i_r + h_r)
    z = jax.nn.sigmoid(i_z + h_z)
    n = jnp.tanh(i_n + r * h_n)
    h_new = (1.0 - z) * n + z * h0
    logits = comb @ p["w_io_t"] + p["b_io"]
    return jax.nn.log_softmax(logits, axis=1), h_new


def letter_to_onehot(letter):
    v = [0.0] * N_LETTERS
    v[ALL_LETTERS.find(letter)] = 1.0
    return v


def lines_to_tensor(lines):
    """(T, B, N_LETTERS) one-hot encoding, batched lineToTensor."""
    T = len(lines[0])
    return jnp.asarray([[letter_to_onehot(line[t]) for line in lines]
                        for t in range(T)], jnp.float32)


if __name__ == "__main__":
    key = jax.random.PRNGKey(0)
    pkey, hkey = jax.random.split(key)
    params = init_params(pkey, N_LETTERS, HIDDEN_SIZE, OUTPUT_SIZE)
    fused = fuse_params(params)

    names = ["Albertus", "Brunhild"]                  # seq_len = 8, batch = 2
    x_seq = lines_to_tensor(names)                    # (8, 2, 57) one-hot letters
    hidden = 0.1 * jax.random.normal(hkey, (BATCH, HIDDEN_SIZE), jnp.float32)

    log_probs, h_final = jax.block_until_ready(
        gru_sequence_forward(x_seq, hidden, fused))

    assert log_probs.shape == (x_seq.shape[0], BATCH, OUTPUT_SIZE)
    assert h_final.shape == (BATCH, HIDDEN_SIZE)

    # Verify every timestep's log-probs (which transitively verify h_0..h_{T-2} through
    # the i2o path) plus the final hidden against the PyTorch-equivalent reference.
    h_ref = hidden
    for t in range(x_seq.shape[0]):
        lp_ref, h_ref = gru_forward_ref(x_seq[t], h_ref, params)
        assert jnp.allclose(log_probs[t], lp_ref, atol=1e-4), f"log_probs mismatch @t={t}"
    assert jnp.allclose(h_final, h_ref, atol=1e-4), "final hidden mismatch"

    # Single-step API parity with the module's forward(input, hidden).
    lp0, h0 = jax.block_until_ready(gru_forward(x_seq[0], hidden, fused))
    lp0_ref, h0_ref = gru_forward_ref(x_seq[0], hidden, params)
    assert jnp.allclose(lp0, lp0_ref, atol=1e-4)
    assert jnp.allclose(h0, h0_ref, atol=1e-4)

    print("KERNEL_OK")
</pallas_src>

<mosaic_0001>
module attributes {stable_mosaic.version = 11 : i64} {
  func.func @_gru_seq_kernel(%arg0: i32, %arg1: memref<8x2x57xf32, #tpu.memory_space<vmem>>, %arg2: memref<2x32xf32, #tpu.memory_space<vmem>>, %arg3: memref<57x128xf32, #tpu.memory_space<vmem>>, %arg4: memref<32x128xf32, #tpu.memory_space<vmem>>, %arg5: memref<2x128xf32, #tpu.memory_space<vmem>>, %arg6: memref<8x2x128xf32, #tpu.memory_space<vmem>>, %arg7: memref<2x32xf32, #tpu.memory_space<vmem>>) attributes {dimension_semantics = [#tpu.dimension_semantics<arbitrary>], iteration_bounds = array<i64: 1>, scalar_prefetch = 0 : i64, scratch_operands = 0 : i64, tpu.core_type = #tpu.core_type<tc>, window_params = [{transform_indices = @transform_0, window_bounds = array<i64: 8, 2, 57>}, {pipeline_mode = #tpu.pipeline_mode<synchronous>, transform_indices = @transform_1, window_bounds = array<i64: 2, 32>}, {pipeline_mode = #tpu.pipeline_mode<synchronous>, transform_indices = @transform_2, window_bounds = array<i64: 57, 128>}, {pipeline_mode = #tpu.pipeline_mode<synchronous>, transform_indices = @transform_3, window_bounds = array<i64: 32, 128>}, {pipeline_mode = #tpu.pipeline_mode<synchronous>, transform_indices = @transform_4, window_bounds = array<i64: 2, 128>}, {transform_indices = @transform_5, window_bounds = array<i64: 8, 2, 128>}, {pipeline_mode = #tpu.pipeline_mode<synchronous>, transform_indices = @transform_6, window_bounds = array<i64: 2, 32>}]} {
    %c0_i32 = arith.constant 0 : i32
    %0 = arith.cmpi eq, %arg0, %c0_i32 : i32
    %1 = arith.extui %0 : i1 to i32
    %c0_i32_0 = arith.constant 0 : i32
    %2 = arith.cmpi ne, %1, %c0_i32_0 : i32
    scf.if %2 {
      %c0_99 = arith.constant 0 : index
      %c0_100 = arith.constant 0 : index
      %349 = vector.load %arg2[%c0_99, %c0_100] : memref<2x32xf32, #tpu.memory_space<vmem>>, vector<2x32xf32>
      %c0_101 = arith.constant 0 : index
      %c0_102 = arith.constant 0 : index
      %350 = vector.load %arg7[%c0_101, %c0_102] : memref<2x32xf32, #tpu.memory_space<vmem>>, vector<2x32xf32>
      tpu.vector_store %arg7[%c0_101, %c0_102], %349 {strides = array<i32>} : memref<2x32xf32, #tpu.memory_space<vmem>>, vector<2x32xf32>,
    } else {
    }
    %c0 = arith.constant 0 : index
    %c0_1 = arith.constant 0 : index
    %3 = vector.load %arg3[%c0, %c0_1] : memref<57x128xf32, #tpu.memory_space<vmem>>, vector<57x128xf32>
    %c0_2 = arith.constant 0 : index
    %c0_3 = arith.constant 0 : index
    %4 = vector.load %arg4[%c0_2, %c0_3] : memref<32x128xf32, #tpu.memory_space<vmem>>, vector<32x128xf32>
    %c0_4 = arith.constant 0 : index
    %c0_5 = arith.constant 0 : index
    %5 = vector.load %arg5[%c0_4, %c0_5] : memref<2x128xf32, #tpu.memory_space<vmem>>, vector<1x128xf32>
    %6 = vector.shape_cast %5 : vector<1x128xf32> to vector<1x128xf32>
    %7 = vector.broadcast %6 : vector<1x128xf32> to vector<2x128xf32>
    %c1 = arith.constant 1 : index
    %c0_6 = arith.constant 0 : index
    %8 = vector.load %arg5[%c1, %c0_6] : memref<2x128xf32, #tpu.memory_space<vmem>>, vector<1x32xf32>
    %9 = vector.shape_cast %8 : vector<1x32xf32> to vector<1x32xf32>
    %10 = vector.broadcast %9 : vector<1x32xf32> to vector<2x32xf32>
    %c0_7 = arith.constant 0 : index
    %c0_8 = arith.constant 0 : index
    %11 = vector.load %arg7[%c0_7, %c0_8] : memref<2x32xf32, #tpu.memory_space<vmem>>, vector<2x32xf32>
    %c0_i32_9 = arith.constant 0 : i32
    %12 = arith.index_cast %c0_i32_9 : i32 to index
    %c0_10 = arith.constant 0 : index
    %c0_11 = arith.constant 0 : index
    %13 = vector.load %arg1[%12, %c0_10, %c0_11] : memref<8x2x57xf32, #tpu.memory_space<vmem>>, vector<1x2x57xf32>
    %14 = vector.shape_cast %13 : vector<1x2x57xf32> to vector<2x57xf32>
    %cst = arith.constant dense<0.000000e+00> : vector<2x128xf32>
    %15 = tpu.matmul %14, %3, %cst {dimension_numbers = #tpu.dot_dimension_numbers<[1], [0], [0], [1], [0, 0, 1, 1], [], []>} : vector<2x57xf32>, vector<57x128xf32>, vector<2x128xf32> -> vector<2x128xf32>
    %cst_12 = arith.constant dense<0.000000e+00> : vector<2x128xf32>
    %16 = tpu.matmul %11, %4, %cst_12 {dimension_numbers = #tpu.dot_dimension_numbers<[1], [0], [0], [1], [0, 0, 1, 1], [], []>} : vector<2x32xf32>, vector<32x128xf32>, vector<2x128xf32> -> vector<2x128xf32>
    %17 = arith.addf %15, %16 : vector<2x128xf32>
    %18 = arith.addf %17, %7 : vector<2x128xf32>
    %19 = vector.extract_strided_slice %18 {offsets = [0, 0], sizes = [2, 32], strides = [1, 1]} : vector<2x128xf32> to vector<2x32xf32>
    %20 = arith.negf %19 : vector<2x32xf32>
    %21 = math.exp %20 : vector<2x32xf32>
    %cst_13 = arith.constant 1.000000e+00 : f32
    %22 = vector.broadcast %cst_13 : f32 to vector<2x32xf32>
    %23 = arith.addf %22, %21 : vector<2x32xf32>
    %24 = arith.divf %22, %23 : vector<2x32xf32>
    %25 = vector.extract_strided_slice %18 {offsets = [0, 32], sizes = [2, 32], strides = [1, 1]} : vector<2x128xf32> to vector<2x32xf32>
    %26 = arith.negf %25 : vector<2x32xf32>
    %27 = math.exp %26 : vector<2x32xf32>
    %cst_14 = arith.constant 1.000000e+00 : f32
    %28 = vector.broadcast %cst_14 : f32 to vector<2x32xf32>
    %29 = arith.addf %28, %27 : vector<2x32xf32>
    %30 = arith.divf %28, %29 : vector<2x32xf32>
    %31 = vector.extract_strided_slice %18 {offsets = [0, 64], sizes = [2, 32], strides = [1, 1]} : vector<2x128xf32> to vector<2x32xf32>
    %32 = arith.mulf %24, %10 : vector<2x32xf32>
    %33 = arith.addf %31, %32 : vector<2x32xf32>
    %34 = math.tanh %33 : vector<2x32xf32>
    %cst_15 = arith.constant 1.000000e+00 : f32
    %35 = vector.broadcast %cst_15 : f32 to vector<2x32xf32>
    %36 = arith.subf %35, %30 : vector<2x32xf32>
    %37 = arith.mulf %36, %34 : vector<2x32xf32>
    %38 = vector.extract_strided_slice %18 {offsets = [0, 96], sizes = [2, 8], strides = [1, 1]} : vector<2x128xf32> to vector<2x8xf32>
    %cst_16 = arith.constant dense<0xFF800000> : vector<2xf32>
    %39 = vector.multi_reduction <maximumf>, %38, %cst_16 [1] : vector<2x8xf32> to vector<2xf32>
    %40 = vector.shape_cast %39 : vector<2xf32> to vector<2x1xf32>
    %41 = vector.broadcast %40 : vector<2x1xf32> to vector<2x8xf32>
    %42 = arith.subf %38, %41 : vector<2x8xf32>
    %43 = math.exp %42 : vector<2x8xf32>
    %cst_17 = arith.constant dense<0.000000e+00> : vector<2xf32>
    %44 = vector.multi_reduction <add>, %43, %cst_17 [1] : vector<2x8xf32> to vector<2xf32>
    %45 = vector.shape_cast %44 : vector<2xf32> to vector<2x1xf32>
    %46 = math.log %45 : vector<2x1xf32>
    %47 = arith.addf %40, %46 : vector<2x1xf32>
    %48 = vector.broadcast %47 : vector<2x1xf32> to vector<2x128xf32>
    %49 = arith.subf %18, %48 : vector<2x128xf32>
    %50 = arith.index_cast %c0_i32_9 : i32 to index
    %c0_18 = arith.constant 0 : index
    %c0_19 = arith.constant 0 : index
    %51 = vector.load %arg6[%50, %c0_18, %c0_19] : memref<8x2x128xf32, #tpu.memory_space<vmem>>, vector<1x2x128xf32>
    %52 = vector.shape_cast %51 : vector<1x2x128xf32> to vector<2x128xf32>
    %53 = vector.shape_cast %49 : vector<2x128xf32> to vector<1x2x128xf32>
    tpu.vector_store %arg6[%50, %c0_18, %c0_19], %53 {strides = array<i32>} : memref<8x2x128xf32, #tpu.memory_space<vmem>>, vector<1x2x128xf32>,
    %c1_i32 = arith.constant 1 : i32
    %54 = arith.index_cast %c1_i32 : i32 to index
    %c0_20 = arith.constant 0 : index
    %c0_21 = arith.constant 0 : index
    %55 = vector.load %arg1[%54, %c0_20, %c0_21] : memref<8x2x57xf32, #tpu.memory_space<vmem>>, vector<1x2x57xf32>
    %56 = vector.shape_cast %55 : vector<1x2x57xf32> to vector<2x57xf32>
    %cst_22 = arith.constant dense<0.000000e+00> : vector<2x128xf32>
    %57 = tpu.matmul %56, %3, %cst_22 {dimension_numbers = #tpu.dot_dimension_numbers<[1], [0], [0], [1], [0, 0, 1, 1], [], []>} : vector<2x57xf32>, vector<57x128xf32>, vector<2x128xf32> -> vector<2x128xf32>
    %cst_23 = arith.constant dense<0.000000e+00> : vector<2x128xf32>
    %58 = tpu.matmul %37, %4, %cst_23 {dimension_numbers = #tpu.dot_dimension_numbers<[1], [0], [0], [1], [0, 0, 1, 1], [], []>} : vector<2x32xf32>, vector<32x128xf32>, vector<2x128xf32> -> vector<2x128xf32>
    %59 = arith.addf %57, %58 : vector<2x128xf32>
    %60 = arith.addf %59, %7 : vector<2x128xf32>
    %61 = vector.extract_strided_slice %60 {offsets = [0, 0], sizes = [2, 32], strides = [1, 1]} : vector<2x128xf32> to vector<2x32xf32>
    %62 = arith.negf %61 : vector<2x32xf32>
    %63 = math.exp %62 : vector<2x32xf32>
    %cst_24 = arith.constant 1.000000e+00 : f32
    %64 = vector.broadcast %cst_24 : f32 to vector<2x32xf32>
    %65 = arith.addf %64, %63 : vector<2x32xf32>
    %66 = arith.divf %64, %65 : vector<2x32xf32>
    %67 = vector.extract_strided_slice %60 {offsets = [0, 32], sizes = [2, 32], strides = [1, 1]} : vector<2x128xf32> to vector<2x32xf32>
    %68 = arith.negf %67 : vector<2x32xf32>
    %69 = math.exp %68 : vector<2x32xf32>
    %cst_25 = arith.constant 1.000000e+00 : f32
    %70 = vector.broadcast %cst_25 : f32 to vector<2x32xf32>
    %71 = arith.addf %70, %69 : vector<2x32xf32>
    %72 = arith.divf %70, %71 : vector<2x32xf32>
    %73 = vector.extract_strided_slice %60 {offsets = [0, 64], sizes = [2, 32], strides = [1, 1]} : vector<2x128xf32> to vector<2x32xf32>
    %74 = arith.mulf %66, %10 : vector<2x32xf32>
    %75 = arith.addf %73, %74 : vector<2x32xf32>
    %76 = math.tanh %75 : vector<2x32xf32>
    %cst_26 = arith.constant 1.000000e+00 : f32
    %77 = vector.broadcast %cst_26 : f32 to vector<2x32xf32>
    %78 = arith.subf %77, %72 : vector<2x32xf32>
    %79 = arith.mulf %78, %76 : vector<2x32xf32>
    %80 = vector.extract_strided_slice %60 {offsets = [0, 96], sizes = [2, 8], strides = [1, 1]} : vector<2x128xf32> to vector<2x8xf32>
    %cst_27 = arith.constant dense<0xFF800000> : vector<2xf32>
    %81 = vector.multi_reduction <maximumf>, %80, %cst_27 [1] : vector<2x8xf32> to vector<2xf32>
    %82 = vector.shape_cast %81 : vector<2xf32> to vector<2x1xf32>
    %83 = vector.broadcast %82 : vector<2x1xf32> to vector<2x8xf32>
    %84 = arith.subf %80, %83 : vector<2x8xf32>
    %85 = math.exp %84 : vector<2x8xf32>
    %cst_28 = arith.constant dense<0.000000e+00> : vector<2xf32>
    %86 = vector.multi_reduction <add>, %85, %cst_28 [1] : vector<2x8xf32> to vector<2xf32>
    %87 = vector.shape_cast %86 : vector<2xf32> to vector<2x1xf32>
    %88 = math.log %87 : vector<2x1xf32>
    %89 = arith.addf %82, %88 : vector<2x1xf32>
    %90 = vector.broadcast %89 : vector<2x1xf32> to vector<2x128xf32>
    %91 = arith.subf %60, %90 : vector<2x128xf32>
    %92 = arith.index_cast %c1_i32 : i32 to index
    %c0_29 = arith.constant 0 : index
    %c0_30 = arith.constant 0 : index
    %93 = vector.load %arg6[%92, %c0_29, %c0_30] : memref<8x2x128xf32, #tpu.memory_space<vmem>>, vector<1x2x128xf32>
    %94 = vector.shape_cast %93 : vector<1x2x128xf32> to vector<2x128xf32>
    %95 = vector.shape_cast %91 : vector<2x128xf32> to vector<1x2x128xf32>
    tpu.vector_store %arg6[%92, %c0_29, %c0_30], %95 {strides = array<i32>} : memref<8x2x128xf32, #tpu.memory_space<vmem>>, vector<1x2x128xf32>,
    %c2_i32 = arith.constant 2 : i32
    %96 = arith.index_cast %c2_i32 : i32 to index
    %c0_31 = arith.constant 0 : index
    %c0_32 = arith.constant 0 : index
    %97 = vector.load %arg1[%96, %c0_31, %c0_32] : memref<8x2x57xf32, #tpu.memory_space<vmem>>, vector<1x2x57xf32>
    %98 = vector.shape_cast %97 : vector<1x2x57xf32> to vector<2x57xf32>
    %cst_33 = arith.constant dense<0.000000e+00> : vector<2x128xf32>
    %99 = tpu.matmul %98, %3, %cst_33 {dimension_numbers = #tpu.dot_dimension_numbers<[1], [0], [0], [1], [0, 0, 1, 1], [], []>} : vector<2x57xf32>, vector<57x128xf32>, vector<2x128xf32> -> vector<2x128xf32>
    %cst_34 = arith.constant dense<0.000000e+00> : vector<2x128xf32>
    %100 = tpu.matmul %79, %4, %cst_34 {dimension_numbers = #tpu.dot_dimension_numbers<[1], [0], [0], [1], [0, 0, 1, 1], [], []>} : vector<2x32xf32>, vector<32x128xf32>, vector<2x128xf32> -> vector<2x128xf32>
    %101 = arith.addf %99, %100 : vector<2x128xf32>
    %102 = arith.addf %101, %7 : vector<2x128xf32>
    %103 = vector.extract_strided_slice %102 {offsets = [0, 0], sizes = [2, 32], strides = [1, 1]} : vector<2x128xf32> to vector<2x32xf32>
    %104 = arith.negf %103 : vector<2x32xf32>
    %105 = math.exp %104 : vector<2x32xf32>
    %cst_35 = arith.constant 1.000000e+00 : f32
    %106 = vector.broadcast %cst_35 : f32 to vector<2x32xf32>
    %107 = arith.addf %106, %105 : vector<2x32xf32>
    %108 = arith.divf %106, %107 : vector<2x32xf32>
    %109 = vector.extract_strided_slice %102 {offsets = [0, 32], sizes = [2, 32], strides = [1, 1]} : vector<2x128xf32> to vector<2x32xf32>
    %110 = arith.negf %109 : vector<2x32xf32>
    %111 = math.exp %110 : vector<2x32xf32>
    %cst_36 = arith.constant 1.000000e+00 : f32
    %112 = vector.broadcast %cst_36 : f32 to vector<2x32xf32>
    %113 = arith.addf %112, %111 : vector<2x32xf32>
    %114 = arith.divf %112, %113 : vector<2x32xf32>
    %115 = vector.extract_strided_slice %102 {offsets = [0, 64], sizes = [2, 32], strides = [1, 1]} : vector<2x128xf32> to vector<2x32xf32>
    %116 = arith.mulf %108, %10 : vector<2x32xf32>
    %117 = arith.addf %115, %116 : vector<2x32xf32>
    %118 = math.tanh %117 : vector<2x32xf32>
    %cst_37 = arith.constant 1.000000e+00 : f32
    %119 = vector.broadcast %cst_37 : f32 to vector<2x32xf32>
    %120 = arith.subf %119, %114 : vector<2x32xf32>
    %121 = arith.mulf %120, %118 : vector<2x32xf32>
    %122 = vector.extract_strided_slice %102 {offsets = [0, 96], sizes = [2, 8], strides = [1, 1]} : vector<2x128xf32> to vector<2x8xf32>
    %cst_38 = arith.constant dense<0xFF800000> : vector<2xf32>
    %123 = vector.multi_reduction <maximumf>, %122, %cst_38 [1] : vector<2x8xf32> to vector<2xf32>
    %124 = vector.shape_cast %123 : vector<2xf32> to vector<2x1xf32>
    %125 = vector.broadcast %124 : vector<2x1xf32> to vector<2x8xf32>
    %126 = arith.subf %122, %125 : vector<2x8xf32>
    %127 = math.exp %126 : vector<2x8xf32>
    %cst_39 = arith.constant dense<0.000000e+00> : vector<2xf32>
    %128 = vector.multi_reduction <add>, %127, %cst_39 [1] : vector<2x8xf32> to vector<2xf32>
    %129 = vector.shape_cast %128 : vector<2xf32> to vector<2x1xf32>
    %130 = math.log %129 : vector<2x1xf32>
    %131 = arith.addf %124, %130 : vector<2x1xf32>
    %132 = vector.broadcast %131 : vector<2x1xf32> to vector<2x128xf32>
    %133 = arith.subf %102, %132 : vector<2x128xf32>
    %134 = arith.index_cast %c2_i32 : i32 to index
    %c0_40 = arith.constant 0 : index
    %c0_41 = arith.constant 0 : index
    %135 = vector.load %arg6[%134, %c0_40, %c0_41] : memref<8x2x128xf32, #tpu.memory_space<vmem>>, vector<1x2x128xf32>
    %136 = vector.shape_cast %135 : vector<1x2x128xf32> to vector<2x128xf32>
    %137 = vector.shape_cast %133 : vector<2x128xf32> to vector<1x2x128xf32>
    tpu.vector_store %arg6[%134, %c0_40, %c0_41], %137 {strides = array<i32>} : memref<8x2x128xf32, #tpu.memory_space<vmem>>, vector<1x2x128xf32>,
    %c3_i32 = arith.constant 3 : i32
    %138 = arith.index_cast %c3_i32 : i32 to index
    %c0_42 = arith.constant 0 : index
    %c0_43 = arith.constant 0 : index
    %139 = vector.load %arg1[%138, %c0_42, %c0_43] : memref<8x2x57xf32, #tpu.memory_space<vmem>>, vector<1x2x57xf32>
    %140 = vector.shape_cast %139 : vector<1x2x57xf32> to vector<2x57xf32>
    %cst_44 = arith.constant dense<0.000000e+00> : vector<2x128xf32>
    %141 = tpu.matmul %140, %3, %cst_44 {dimension_numbers = #tpu.dot_dimension_numbers<[1], [0], [0], [1], [0, 0, 1, 1], [], []>} : vector<2x57xf32>, vector<57x128xf32>, vector<2x128xf32> -> vector<2x128xf32>
    %cst_45 = arith.constant dense<0.000000e+00> : vector<2x128xf32>
    %142 = tpu.matmul %121, %4, %cst_45 {dimension_numbers = #tpu.dot_dimension_numbers<[1], [0], [0], [1], [0, 0, 1, 1], [], []>} : vector<2x32xf32>, vector<32x128xf32>, vector<2x128xf32> -> vector<2x128xf32>
    %143 = arith.addf %141, %142 : vector<2x128xf32>
    %144 = arith.addf %143, %7 : vector<2x128xf32>
    %145 = vector.extract_strided_slice %144 {offsets = [0, 0], sizes = [2, 32], strides = [1, 1]} : vector<2x128xf32> to vector<2x32xf32>
    %146 = arith.negf %145 : vector<2x32xf32>
    %147 = math.exp %146 : vector<2x32xf32>
    %cst_46 = arith.constant 1.000000e+00 : f32
    %148 = vector.broadcast %cst_46 : f32 to vector<2x32xf32>
    %149 = arith.addf %148, %147 : vector<2x32xf32>
    %150 = arith.divf %148, %149 : vector<2x32xf32>
    %151 = vector.extract_strided_slice %144 {offsets = [0, 32], sizes = [2, 32], strides = [1, 1]} : vector<2x128xf32> to vector<2x32xf32>
    %152 = arith.negf %151 : vector<2x32xf32>
    %153 = math.exp %152 : vector<2x32xf32>
    %cst_47 = arith.constant 1.000000e+00 : f32
    %154 = vector.broadcast %cst_47 : f32 to vector<2x32xf32>
    %155 = arith.addf %154, %153 : vector<2x32xf32>
    %156 = arith.divf %154, %155 : vector<2x32xf32>
    %157 = vector.extract_strided_slice %144 {offsets = [0, 64], sizes = [2, 32], strides = [1, 1]} : vector<2x128xf32> to vector<2x32xf32>
    %158 = arith.mulf %150, %10 : vector<2x32xf32>
    %159 = arith.addf %157, %158 : vector<2x32xf32>
    %160 = math.tanh %159 : vector<2x32xf32>
    %cst_48 = arith.constant 1.000000e+00 : f32
    %161 = vector.broadcast %cst_48 : f32 to vector<2x32xf32>
    %162 = arith.subf %161, %156 : vector<2x32xf32>
    %163 = arith.mulf %162, %160 : vector<2x32xf32>
    %164 = vector.extract_strided_slice %144 {offsets = [0, 96], sizes = [2, 8], strides = [1, 1]} : vector<2x128xf32> to vector<2x8xf32>
    %cst_49 = arith.constant dense<0xFF800000> : vector<2xf32>
    %165 = vector.multi_reduction <maximumf>, %164, %cst_49 [1] : vector<2x8xf32> to vector<2xf32>
    %166 = vector.shape_cast %165 : vector<2xf32> to vector<2x1xf32>
    %167 = vector.broadcast %166 : vector<2x1xf32> to vector<2x8xf32>
    %168 = arith.subf %164, %167 : vector<2x8xf32>
    %169 = math.exp %168 : vector<2x8xf32>
    %cst_50 = arith.constant dense<0.000000e+00> : vector<2xf32>
    %170 = vector.multi_reduction <add>, %169, %cst_50 [1] : vector<2x8xf32> to vector<2xf32>
    %171 = vector.shape_cast %170 : vector<2xf32> to vector<2x1xf32>
    %172 = math.log %171 : vector<2x1xf32>
    %173 = arith.addf %166, %172 : vector<2x1xf32>
    %174 = vector.broadcast %173 : vector<2x1xf32> to vector<2x128xf32>
    %175 = arith.subf %144, %174 : vector<2x128xf32>
    %176 = arith.index_cast %c3_i32 : i32 to index
    %c0_51 = arith.constant 0 : index
    %c0_52 = arith.constant 0 : index
    %177 = vector.load %arg6[%176, %c0_51, %c0_52] : memref<8x2x128xf32, #tpu.memory_space<vmem>>, vector<1x2x128xf32>
    %178 = vector.shape_cast %177 : vector<1x2x128xf32> to vector<2x128xf32>
    %179 = vector.shape_cast %175 : vector<2x128xf32> to vector<1x2x128xf32>
    tpu.vector_store %arg6[%176, %c0_51, %c0_52], %179 {strides = array<i32>} : memref<8x2x128xf32, #tpu.memory_space<vmem>>, vector<1x2x128xf32>,
    %c4_i32 = arith.constant 4 : i32
    %180 = arith.index_cast %c4_i32 : i32 to index
    %c0_53 = arith.constant 0 : index
    %c0_54 = arith.constant 0 : index
    %181 = vector.load %arg1[%180, %c0_53, %c0_54] : memref<8x2x57xf32, #tpu.memory_space<vmem>>, vector<1x2x57xf32>
    %182 = vector.shape_cast %181 : vector<1x2x57xf32> to vector<2x57xf32>
    %cst_55 = arith.constant dense<0.000000e+00> : vector<2x128xf32>
    %183 = tpu.matmul %182, %3, %cst_55 {dimension_numbers = #tpu.dot_dimension_numbers<[1], [0], [0], [1], [0, 0, 1, 1], [], []>} : vector<2x57xf32>, vector<57x128xf32>, vector<2x128xf32> -> vector<2x128xf32>
    %cst_56 = arith.constant dense<0.000000e+00> : vector<2x128xf32>
    %184 = tpu.matmul %163, %4, %cst_56 {dimension_numbers = #tpu.dot_dimension_numbers<[1], [0], [0], [1], [0, 0, 1, 1], [], []>} : vector<2x32xf32>, vector<32x128xf32>, vector<2x128xf32> -> vector<2x128xf32>
    %185 = arith.addf %183, %184 : vector<2x128xf32>
    %186 = arith.addf %185, %7 : vector<2x128xf32>
    %187 = vector.extract_strided_slice %186 {offsets = [0, 0], sizes = [2, 32], strides = [1, 1]} : vector<2x128xf32> to vector<2x32xf32>
    %188 = arith.negf %187 : vector<2x32xf32>
    %189 = math.exp %188 : vector<2x32xf32>
    %cst_57 = arith.constant 1.000000e+00 : f32
    %190 = vector.broadcast %cst_57 : f32 to vector<2x32xf32>
    %191 = arith.addf %190, %189 : vector<2x32xf32>
    %192 = arith.divf %190, %191 : vector<2x32xf32>
    %193 = vector.extract_strided_slice %186 {offsets = [0, 32], sizes = [2, 32], strides = [1, 1]} : vector<2x128xf32> to vector<2x32xf32>
    %194 = arith.negf %193 : vector<2x32xf32>
    %195 = math.exp %194 : vector<2x32xf32>
    %cst_58 = arith.constant 1.000000e+00 : f32
    %196 = vector.broadcast %cst_58 : f32 to vector<2x32xf32>
    %197 = arith.addf %196, %195 : vector<2x32xf32>
    %198 = arith.divf %196, %197 : vector<2x32xf32>
    %199 = vector.extract_strided_slice %186 {offsets = [0, 64], sizes = [2, 32], strides = [1, 1]} : vector<2x128xf32> to vector<2x32xf32>
    %200 = arith.mulf %192, %10 : vector<2x32xf32>
    %201 = arith.addf %199, %200 : vector<2x32xf32>
    %202 = math.tanh %201 : vector<2x32xf32>
    %cst_59 = arith.constant 1.000000e+00 : f32
    %203 = vector.broadcast %cst_59 : f32 to vector<2x32xf32>
    %204 = arith.subf %203, %198 : vector<2x32xf32>
    %205 = arith.mulf %204, %202 : vector<2x32xf32>
    %206 = vector.extract_strided_slice %186 {offsets = [0, 96], sizes = [2, 8], strides = [1, 1]} : vector<2x128xf32> to vector<2x8xf32>
    %cst_60 = arith.constant dense<0xFF800000> : vector<2xf32>
    %207 = vector.multi_reduction <maximumf>, %206, %cst_60 [1] : vector<2x8xf32> to vector<2xf32>
    %208 = vector.shape_cast %207 : vector<2xf32> to vector<2x1xf32>
    %209 = vector.broadcast %208 : vector<2x1xf32> to vector<2x8xf32>
    %210 = arith.subf %206, %209 : vector<2x8xf32>
    %211 = math.exp %210 : vector<2x8xf32>
    %cst_61 = arith.constant dense<0.000000e+00> : vector<2xf32>
    %212 = vector.multi_reduction <add>, %211, %cst_61 [1] : vector<2x8xf32> to vector<2xf32>
    %213 = vector.shape_cast %212 : vector<2xf32> to vector<2x1xf32>
    %214 = math.log %213 : vector<2x1xf32>
    %215 = arith.addf %208, %214 : vector<2x1xf32>
    %216 = vector.broadcast %215 : vector<2x1xf32> to vector<2x128xf32>
    %217 = arith.subf %186, %216 : vector<2x128xf32>
    %218 = arith.index_cast %c4_i32 : i32 to index
    %c0_62 = arith.constant 0 : index
    %c0_63 = arith.constant 0 : index
    %219 = vector.load %arg6[%218, %c0_62, %c0_63] : memref<8x2x128xf32, #tpu.memory_space<vmem>>, vector<1x2x128xf32>
    %220 = vector.shape_cast %219 : vector<1x2x128xf32> to vector<2x128xf32>
    %221 = vector.shape_cast %217 : vector<2x128xf32> to vector<1x2x128xf32>
    tpu.vector_store %arg6[%218, %c0_62, %c0_63], %221 {strides = array<i32>} : memref<8x2x128xf32, #tpu.memory_space<vmem>>, vector<1x2x128xf32>,
    %c5_i32 = arith.constant 5 : i32
    %222 = arith.index_cast %c5_i32 : i32 to index
    %c0_64 = arith.constant 0 : index
    %c0_65 = arith.constant 0 : index
    %223 = vector.load %arg1[%222, %c0_64, %c0_65] : memref<8x2x57xf32, #tpu.memory_space<vmem>>, vector<1x2x57xf32>
    %224 = vector.shape_cast %223 : vector<1x2x57xf32> to vector<2x57xf32>
    %cst_66 = arith.constant dense<0.000000e+00> : vector<2x128xf32>
    %225 = tpu.matmul %224, %3, %cst_66 {dimension_numbers = #tpu.dot_dimension_numbers<[1], [0], [0], [1], [0, 0, 1, 1], [], []>} : vector<2x57xf32>, vector<57x128xf32>, vector<2x128xf32> -> vector<2x128xf32>
    %cst_67 = arith.constant dense<0.000000e+00> : vector<2x128xf32>
    %226 = tpu.matmul %205, %4, %cst_67 {dimension_numbers = #tpu.dot_dimension_numbers<[1], [0], [0], [1], [0, 0, 1, 1], [], []>} : vector<2x32xf32>, vector<32x128xf32>, vector<2x128xf32> -> vector<2x128xf32>
    %227 = arith.addf %225, %226 : vector<2x128xf32>
    %228 = arith.addf %227, %7 : vector<2x128xf32>
    %229 = vector.extract_strided_slice %228 {offsets = [0, 0], sizes = [2, 32], strides = [1, 1]} : vector<2x128xf32> to vector<2x32xf32>
    %230 = arith.negf %229 : vector<2x32xf32>
    %231 = math.exp %230 : vector<2x32xf32>
    %cst_68 = arith.constant 1.000000e+00 : f32
    %232 = vector.broadcast %cst_68 : f32 to vector<2x32xf32>
    %233 = arith.addf %232, %231 : vector<2x32xf32>
    %234 = arith.divf %232, %233 : vector<2x32xf32>
    %235 = vector.extract_strided_slice %228 {offsets = [0, 32], sizes = [2, 32], strides = [1, 1]} : vector<2x128xf32> to vector<2x32xf32>
    %236 = arith.negf %235 : vector<2x32xf32>
    %237 = math.exp %236 : vector<2x32xf32>
    %cst_69 = arith.constant 1.000000e+00 : f32
    %238 = vector.broadcast %cst_69 : f32 to vector<2x32xf32>
    %239 = arith.addf %238, %237 : vector<2x32xf32>
    %240 = arith.divf %238, %239 : vector<2x32xf32>
    %241 = vector.extract_strided_slice %228 {offsets = [0, 64], sizes = [2, 32], strides = [1, 1]} : vector<2x128xf32> to vector<2x32xf32>
    %242 = arith.mulf %234, %10 : vector<2x32xf32>
    %243 = arith.addf %241, %242 : vector<2x32xf32>
    %244 = math.tanh %243 : vector<2x32xf32>
    %cst_70 = arith.constant 1.000000e+00 : f32
    %245 = vector.broadcast %cst_70 : f32 to vector<2x32xf32>
    %246 = arith.subf %245, %240 : vector<2x32xf32>
    %247 = arith.mulf %246, %244 : vector<2x32xf32>
    %248 = vector.extract_strided_slice %228 {offsets = [0, 96], sizes = [2, 8], strides = [1, 1]} : vector<2x128xf32> to vector<2x8xf32>
    %cst_71 = arith.constant dense<0xFF800000> : vector<2xf32>
    %249 = vector.multi_reduction <maximumf>, %248, %cst_71 [1] : vector<2x8xf32> to vector<2xf32>
    %250 = vector.shape_cast %249 : vector<2xf32> to vector<2x1xf32>
    %251 = vector.broadcast %250 : vector<2x1xf32> to vector<2x8xf32>
    %252 = arith.subf %248, %251 : vector<2x8xf32>
    %253 = math.exp %252 : vector<2x8xf32>
    %cst_72 = arith.constant dense<0.000000e+00> : vector<2xf32>
    %254 = vector.multi_reduction <add>, %253, %cst_72 [1] : vector<2x8xf32> to vector<2xf32>
    %255 = vector.shape_cast %254 : vector<2xf32> to vector<2x1xf32>
    %256 = math.log %255 : vector<2x1xf32>
    %257 = arith.addf %250, %256 : vector<2x1xf32>
    %258 = vector.broadcast %257 : vector<2x1xf32> to vector<2x128xf32>
    %259 = arith.subf %228, %258 : vector<2x128xf32>
    %260 = arith.index_cast %c5_i32 : i32 to index
    %c0_73 = arith.constant 0 : index
    %c0_74 = arith.constant 0 : index
    %261 = vector.load %arg6[%260, %c0_73, %c0_74] : memref<8x2x128xf32, #tpu.memory_space<vmem>>, vector<1x2x128xf32>
    %262 = vector.shape_cast %261 : vector<1x2x128xf32> to vector<2x128xf32>
    %263 = vector.shape_cast %259 : vector<2x128xf32> to vector<1x2x128xf32>
    tpu.vector_store %arg6[%260, %c0_73, %c0_74], %263 {strides = array<i32>} : memref<8x2x128xf32, #tpu.memory_space<vmem>>, vector<1x2x128xf32>,
    %c6_i32 = arith.constant 6 : i32
    %264 = arith.index_cast %c6_i32 : i32 to index
    %c0_75 = arith.constant 0 : index
    %c0_76 = arith.constant 0 : index
    %265 = vector.load %arg1[%264, %c0_75, %c0_76] : memref<8x2x57xf32, #tpu.memory_space<vmem>>, vector<1x2x57xf32>
    %266 = vector.shape_cast %265 : vector<1x2x57xf32> to vector<2x57xf32>
    %cst_77 = arith.constant dense<0.000000e+00> : vector<2x128xf32>
    %267 = tpu.matmul %266, %3, %cst_77 {dimension_numbers = #tpu.dot_dimension_numbers<[1], [0], [0], [1], [0, 0, 1, 1], [], []>} : vector<2x57xf32>, vector<57x128xf32>, vector<2x128xf32> -> vector<2x128xf32>
    %cst_78 = arith.constant dense<0.000000e+00> : vector<2x128xf32>
    %268 = tpu.matmul %247, %4, %cst_78 {dimension_numbers = #tpu.dot_dimension_numbers<[1], [0], [0], [1], [0, 0, 1, 1], [], []>} : vector<2x32xf32>, vector<32x128xf32>, vector<2x128xf32> -> vector<2x128xf32>
    %269 = arith.addf %267, %268 : vector<2x128xf32>
    %270 = arith.addf %269, %7 : vector<2x128xf32>
    %271 = vector.extract_strided_slice %270 {offsets = [0, 0], sizes = [2, 32], strides = [1, 1]} : vector<2x128xf32> to vector<2x32xf32>
    %272 = arith.negf %271 : vector<2x32xf32>
    %273 = math.exp %272 : vector<2x32xf32>
    %cst_79 = arith.constant 1.000000e+00 : f32
    %274 = vector.broadcast %cst_79 : f32 to vector<2x32xf32>
    %275 = arith.addf %274, %273 : vector<2x32xf32>
    %276 = arith.divf %274, %275 : vector<2x32xf32>
    %277 = vector.extract_strided_slice %270 {offsets = [0, 32], sizes = [2, 32], strides = [1, 1]} : vector<2x128xf32> to vector<2x32xf32>
    %278 = arith.negf %277 : vector<2x32xf32>
    %279 = math.exp %278 : vector<2x32xf32>
    %cst_80 = arith.constant 1.000000e+00 : f32
    %280 = vector.broadcast %cst_80 : f32 to vector<2x32xf32>
    %281 = arith.addf %280, %279 : vector<2x32xf32>
    %282 = arith.divf %280, %281 : vector<2x32xf32>
    %283 = vector.extract_strided_slice %270 {offsets = [0, 64], sizes = [2, 32], strides = [1, 1]} : vector<2x128xf32> to vector<2x32xf32>
    %284 = arith.mulf %276, %10 : vector<2x32xf32>
    %285 = arith.addf %283, %284 : vector<2x32xf32>
    %286 = math.tanh %285 : vector<2x32xf32>
    %cst_81 = arith.constant 1.000000e+00 : f32
    %287 = vector.broadcast %cst_81 : f32 to vector<2x32xf32>
    %288 = arith.subf %287, %282 : vector<2x32xf32>
    %289 = arith.mulf %288, %286 : vector<2x32xf32>
    %290 = vector.extract_strided_slice %270 {offsets = [0, 96], sizes = [2, 8], strides = [1, 1]} : vector<2x128xf32> to vector<2x8xf32>
    %cst_82 = arith.constant dense<0xFF800000> : vector<2xf32>
    %291 = vector.multi_reduction <maximumf>, %290, %cst_82 [1] : vector<2x8xf32> to vector<2xf32>
    %292 = vector.shape_cast %291 : vector<2xf32> to vector<2x1xf32>
    %293 = vector.broadcast %292 : vector<2x1xf32> to vector<2x8xf32>
    %294 = arith.subf %290, %293 : vector<2x8xf32>
    %295 = math.exp %294 : vector<2x8xf32>
    %cst_83 = arith.constant dense<0.000000e+00> : vector<2xf32>
    %296 = vector.multi_reduction <add>, %295, %cst_83 [1] : vector<2x8xf32> to vector<2xf32>
    %297 = vector.shape_cast %296 : vector<2xf32> to vector<2x1xf32>
    %298 = math.log %297 : vector<2x1xf32>
    %299 = arith.addf %292, %298 : vector<2x1xf32>
    %300 = vector.broadcast %299 : vector<2x1xf32> to vector<2x128xf32>
    %301 = arith.subf %270, %300 : vector<2x128xf32>
    %302 = arith.index_cast %c6_i32 : i32 to index
    %c0_84 = arith.constant 0 : index
    %c0_85 = arith.constant 0 : index
    %303 = vector.load %arg6[%302, %c0_84, %c0_85] : memref<8x2x128xf32, #tpu.memory_space<vmem>>, vector<1x2x128xf32>
    %304 = vector.shape_cast %303 : vector<1x2x128xf32> to vector<2x128xf32>
    %305 = vector.shape_cast %301 : vector<2x128xf32> to vector<1x2x128xf32>
    tpu.vector_store %arg6[%302, %c0_84, %c0_85], %305 {strides = array<i32>} : memref<8x2x128xf32, #tpu.memory_space<vmem>>, vector<1x2x128xf32>,
    %c7_i32 = arith.constant 7 : i32
    %306 = arith.index_cast %c7_i32 : i32 to index
    %c0_86 = arith.constant 0 : index
    %c0_87 = arith.constant 0 : index
    %307 = vector.load %arg1[%306, %c0_86, %c0_87] : memref<8x2x57xf32, #tpu.memory_space<vmem>>, vector<1x2x57xf32>
    %308 = vector.shape_cast %307 : vector<1x2x57xf32> to vector<2x57xf32>
    %cst_88 = arith.constant dense<0.000000e+00> : vector<2x128xf32>
    %309 = tpu.matmul %308, %3, %cst_88 {dimension_numbers = #tpu.dot_dimension_numbers<[1], [0], [0], [1], [0, 0, 1, 1], [], []>} : vector<2x57xf32>, vector<57x128xf32>, vector<2x128xf32> -> vector<2x128xf32>
    %cst_89 = arith.constant dense<0.000000e+00> : vector<2x128xf32>
    %310 = tpu.matmul %289, %4, %cst_89 {dimension_numbers = #tpu.dot_dimension_numbers<[1], [0], [0], [1], [0, 0, 1, 1], [], []>} : vector<2x32xf32>, vector<32x128xf32>, vector<2x128xf32> -> vector<2x128xf32>
    %311 = arith.addf %309, %310 : vector<2x128xf32>
    %312 = arith.addf %311, %7 : vector<2x128xf32>
    %313 = vector.extract_strided_slice %312 {offsets = [0, 0], sizes = [2, 32], strides = [1, 1]} : vector<2x128xf32> to vector<2x32xf32>
    %314 = arith.negf %313 : vector<2x32xf32>
    %315 = math.exp %314 : vector<2x32xf32>
    %cst_90 = arith.constant 1.000000e+00 : f32
    %316 = vector.broadcast %cst_90 : f32 to vector<2x32xf32>
    %317 = arith.addf %316, %315 : vector<2x32xf32>
    %318 = arith.divf %316, %317 : vector<2x32xf32>
    %319 = vector.extract_strided_slice %312 {offsets = [0, 32], sizes = [2, 32], strides = [1, 1]} : vector<2x128xf32> to vector<2x32xf32>
    %320 = arith.negf %319 : vector<2x32xf32>
    %321 = math.exp %320 : vector<2x32xf32>
    %cst_91 = arith.constant 1.000000e+00 : f32
    %322 = vector.broadcast %cst_91 : f32 to vector<2x32xf32>
    %323 = arith.addf %322, %321 : vector<2x32xf32>
    %324 = arith.divf %322, %323 : vector<2x32xf32>
    %325 = vector.extract_strided_slice %312 {offsets = [0, 64], sizes = [2, 32], strides = [1, 1]} : vector<2x128xf32> to vector<2x32xf32>
    %326 = arith.mulf %318, %10 : vector<2x32xf32>
    %327 = arith.addf %325, %326 : vector<2x32xf32>
    %328 = math.tanh %327 : vector<2x32xf32>
    %cst_92 = arith.constant 1.000000e+00 : f32
    %329 = vector.broadcast %cst_92 : f32 to vector<2x32xf32>
    %330 = arith.subf %329, %324 : vector<2x32xf32>
    %331 = arith.mulf %330, %328 : vector<2x32xf32>
    %332 = vector.extract_strided_slice %312 {offsets = [0, 96], sizes = [2, 8], strides = [1, 1]} : vector<2x128xf32> to vector<2x8xf32>
    %cst_93 = arith.constant dense<0xFF800000> : vector<2xf32>
    %333 = vector.multi_reduction <maximumf>, %332, %cst_93 [1] : vector<2x8xf32> to vector<2xf32>
    %334 = vector.shape_cast %333 : vector<2xf32> to vector<2x1xf32>
    %335 = vector.broadcast %334 : vector<2x1xf32> to vector<2x8xf32>
    %336 = arith.subf %332, %335 : vector<2x8xf32>
    %337 = math.exp %336 : vector<2x8xf32>
    %cst_94 = arith.constant dense<0.000000e+00> : vector<2xf32>
    %338 = vector.multi_reduction <add>, %337, %cst_94 [1] : vector<2x8xf32> to vector<2xf32>
    %339 = vector.shape_cast %338 : vector<2xf32> to vector<2x1xf32>
    %340 = math.log %339 : vector<2x1xf32>
    %341 = arith.addf %334, %340 : vector<2x1xf32>
    %342 = vector.broadcast %341 : vector<2x1xf32> to vector<2x128xf32>
    %343 = arith.subf %312, %342 : vector<2x128xf32>
    %344 = arith.index_cast %c7_i32 : i32 to index
    %c0_95 = arith.constant 0 : index
    %c0_96 = arith.constant 0 : index
    %345 = vector.load %arg6[%344, %c0_95, %c0_96] : memref<8x2x128xf32, #tpu.memory_space<vmem>>, vector<1x2x128xf32>
    %346 = vector.shape_cast %345 : vector<1x2x128xf32> to vector<2x128xf32>
    %347 = vector.shape_cast %343 : vector<2x128xf32> to vector<1x2x128xf32>
    tpu.vector_store %arg6[%344, %c0_95, %c0_96], %347 {strides = array<i32>} : memref<8x2x128xf32, #tpu.memory_space<vmem>>, vector<1x2x128xf32>,
    %c8_i32 = arith.constant 8 : i32
    %c0_97 = arith.constant 0 : index
    %c0_98 = arith.constant 0 : index
    %348 = vector.load %arg7[%c0_97, %c0_98] : memref<2x32xf32, #tpu.memory_space<vmem>>, vector<2x32xf32>
    tpu.vector_store %arg7[%c0_97, %c0_98], %331 {strides = array<i32>} : memref<2x32xf32, #tpu.memory_space<vmem>>, vector<2x32xf32>,
    return
  }
  func.func @transform_0(%arg0: i32) -> (i32, i32, i32) {
    %c0_i32 = arith.constant 0 : i32
    %c0_i32_0 = arith.constant 0 : i32
    %c0_i32_1 = arith.constant 0 : i32
    return %arg0, %c0_i32, %c0_i32_0 : i32, i32, i32
  }
  func.func @transform_1(%arg0: i32) -> (i32, i32) {
    %c0_i32 = arith.constant 0 : i32
    %c0_i32_0 = arith.constant 0 : i32
    %c0_i32_1 = arith.constant 0 : i32
    return %c0_i32, %c0_i32_0 : i32, i32
  }
  func.func @transform_2(%arg0: i32) -> (i32, i32) {
    %c0_i32 = arith.constant 0 : i32
    %c0_i32_0 = arith.constant 0 : i32
    %c0_i32_1 = arith.constant 0 : i32
    return %c0_i32, %c0_i32_0 : i32, i32
  }
  func.func @transform_3(%arg0: i32) -> (i32, i32) {
    %c0_i32 = arith.constant 0 : i32
    %c0_i32_0 = arith.constant 0 : i32
    %c0_i32_1 = arith.constant 0 : i32
    return %c0_i32, %c0_i32_0 : i32, i32
  }
  func.func @transform_4(%arg0: i32) -> (i32, i32) {
    %c0_i32 = arith.constant 0 : i32
    %c0_i32_0 = arith.constant 0 : i32
    %c0_i32_1 = arith.constant 0 : i32
    return %c0_i32, %c0_i32_0 : i32, i32
  }
  func.func @transform_5(%arg0: i32) -> (i32, i32, i32) {
    %c0_i32 = arith.constant 0 : i32
    %c0_i32_0 = arith.constant 0 : i32
    %c0_i32_1 = arith.constant 0 : i32
    return %arg0, %c0_i32, %c0_i32_0 : i32, i32, i32
  }
  func.func @transform_6(%arg0: i32) -> (i32, i32) {
    %c0_i32 = arith.constant 0 : i32
    %c0_i32_0 = arith.constant 0 : i32
    %c0_i32_1 = arith.constant 0 : i32
    return %c0_i32, %c0_i32_0 : i32, i32
  }
}

</mosaic_0001>

<bundles_post_ra>
// kernel: tpu_custom_call.1
= control target key start
LH: loop header
LB: loop body
LE: loop exit
PB: predicated region body
PF: predicated region fallthrough
CT: control target
= control target key end

     0   :  { %12 = vsyncpa [#allocation3], 0  ;;  %s2752_s0 = inlined_call_operand.hbm [shape: f32[8,2,57], index: 0, kind: input, shape index: {}]   ;;  %s2753_s1 = inlined_call_operand.hbm [shape: f32[2,32], index: 1, kind: input, shape index: {}]   ;;  %s2754_s2 = inlined_call_operand.hbm [shape: f32[57,128], index: 2, kind: input, shape index: {}]   ;;  %s2755_s3 = inlined_call_operand.hbm [shape: f32[32,128], index: 3, kind: input, shape index: {}]   ;;  %s2756_s4 = inlined_call_operand.vmem [shape: f32[2,128], index: 4, kind: input, shape index: {}]   ;;  %s2757_s5 = inlined_call_operand.hbm [shape: f32[8,2,128], index: 5, kind: output, shape index: {0}]   ;;  %s2758_s6 = inlined_call_operand.hbm [shape: f32[2,32], index: 6, kind: output, shape index: {1}]  }
   0x1   :  { %13 = vsyncpa [#allocation6], 0 }
   0x2   :  { %14 = vsyncpa [#allocation9], 0 }
   0x3   :  { %15 = vsyncpa [#allocation4], 0 }
   0x4   :  { %16 = vsyncpa [#allocation12], 0  ;;  %s2272_s21 = smov [#allocation5]   ;;  %s2273_s23 = smov [#allocation2]  }
   0x5   :  { %s35_s22 = sshll.u32 %s2272_s21, 4  ;;  %s22_s24 = sshll.u32 %s2273_s23, 4  ;;  %s36_s22 = int_to_ptr.vmem [resolvable:$true] %s35_s22  ;;  %s23_s24 = int_to_ptr.vmem [resolvable:$true] %s22_s24 }
   0x6   :  { %s2150_s25 = scalar_lea.vmem %s36_s22, 32  ;;  %p2155_p1 = scmp.lt.s32.totalorder %s36_s22, %s36_s22 }
   0x7   :  { %p2151_p0 = scmp.ne.s32.totalorder %s36_s22, %s2150_s25  ;;  %p2156_p2 = scmp.lt.s32.totalorder %s2150_s25, %s2150_s25 }
   0x9   :  { %p2157_p3 = por %p2156_p2, %p2155_p1 }
   0xb   :  { %p2158_p4 = pnand %p2157_p3, %p2151_p0 }
   0xd   :  { %2161 = shalt.err (!%p2158_p4)
}
   0xe   :  { %38 = dma.hbm_to_vmem [thread:$0]  %s2753_s1, 32, %s36_s22, [#allocation6]  }
   0xf   :  { %s2170_s28 = scalar_lea.vmem %s23_s24, 256  ;;  %p2175_p6 = scmp.lt.s32.totalorder %s23_s24, %s23_s24 }
  0x10   :  { %p2171_p5 = scmp.ne.s32.totalorder %s23_s24, %s2170_s28  ;;  %p2176_p7 = scmp.lt.s32.totalorder %s2170_s28, %s2170_s28 }
  0x12   :  { %p2177_p8 = por %p2176_p7, %p2175_p6 }
  0x14   :  { %p2178_p9 = pnand %p2177_p8, %p2171_p5 }
  0x16   :  { %2181 = shalt.err (!%p2178_p9)
}
  0x17   :  { %s2274_s29 = smov 32   ;;  %s2275_s30 = smov 2  }
  0x18   :  { %28 = dma.hbm_to_vmem [thread:$0]  %s2752_s0, 256, %s23_s24, [#allocation3], %s2274_s29, %s2274_s29, %s2275_s30  }
  0x19   :  { %s2276_s9 = smov [#allocation7]  }
  0x1a   :  { %s44_s10 = sshll.u32 %s2276_s9, 4  ;;  %s45_s10 = int_to_ptr.vmem [resolvable:$true] %s44_s10 }
  0x1b   :  { %s2190_s1 = scalar_lea.vmem %s45_s10, 1024  ;;  %p2195_p11 = scmp.lt.s32.totalorder %s45_s10, %s45_s10 }
  0x1c   :  { %p2191_p10 = scmp.ne.s32.totalorder %s45_s10, %s2190_s1  ;;  %p2196_p12 = scmp.lt.s32.totalorder %s2190_s1, %s2190_s1 }
  0x1e   :  { %p2197_p13 = por %p2196_p12, %p2195_p11 }
  0x20   :  { %p2198_p0 = pnand %p2197_p13, %p2191_p10 }
  0x22   :  { %2201 = shalt.err (!%p2198_p0)
}
  0x23   :  { %s2277_s11 = smov 128   ;;  %s2278_s12 = smov 8  }
  0x24   :  { %50 = dma.hbm_to_vmem [thread:$0]  %s2754_s2, 1024, %s45_s10, [#allocation6], %s2277_s11, %s2277_s11, %s2278_s12  }
  0x25   :  { %s2279_s15 = smov [#allocation8]  }
  0x26   :  { %s56_s16 = sshll.u32 %s2279_s15, 4  ;;  %s57_s16 = int_to_ptr.vmem [resolvable:$true] %s56_s16 }
  0x27   :  { %s2210_s0 = scalar_lea.vmem %s57_s16, 512  ;;  %p2215_p2 = scmp.lt.s32.totalorder %s57_s16, %s57_s16 }
  0x28   :  { %p2211_p1 = scmp.ne.s32.totalorder %s57_s16, %s2210_s0  ;;  %p2216_p3 = scmp.lt.s32.totalorder %s2210_s0, %s2210_s0 }
  0x2a   :  { %p2217_p4 = por %p2216_p3, %p2215_p2 }
  0x2c   :  { %p2218_p5 = pnand %p2217_p4, %p2211_p1 }
  0x2e   :  { %2221 = shalt.err (!%p2218_p5)
}
  0x2f   :  { %62 = dma.hbm_to_vmem [thread:$0]  %s2755_s3, 512, %s57_s16, [#allocation9], %s2277_s11, %s2277_s11, %s2278_s12  }
  0x30   :  { %2262 = dma.done.wait [#allocation3], 256  }
  0x31   :  { %2263 = vsyncadd [#allocation3], 4294967040 }
  0x32   :  { %2264 = dma.done.wait [#allocation6], 1056  }
  0x33   :  { %2265 = vsyncadd [#allocation6], 4294966240 }
  0x34   :  { %2266 = dma.done.wait [#allocation9], 512  }
  0x35   :  { %2267 = vsyncadd [#allocation9], 4294966784  ;;  %v2280_v0 = vmov 0.0   ;;  %vm2281_vm0 = vmmov 0   ;;  %vm82_vm1 = vcmask 254976   ;;  %v2342_v1 = vld [vmem:[#allocation8 + $0x18] sm:$0xff] }
  0x36   :  { %1808 = vmatprep.subr.mxu1 %v2280_v0  ;;  %1816 = vmatprep.mubr.msk.f32.mxu1 %vm2281_vm0, %v2280_v0  ;;  %v2344_v2 = vld [vmem:[#allocation8 + $0x10] sm:$0xff]  ;;  %v81_v3 = vld [vmem:[#allocation5] sm:$0x3]  ;;  %v2349_v4 = vld [vmem:[#allocation8 + $0x8] sm:$0xff]  ;;  %vm108_vm2 = vcmask 261120   ;;  %vm186_vm3 = vcmask 1040384  }
  0x37   :  { %1838 = vmatprep.subr.mxu0 %v2280_v0  ;;  %1846 = vmatprep.mubr.msk.f32.mxu0 %vm2281_vm0, %v2280_v0  ;;  %83 = vst.msk [vmem:[#allocation11] sm:$0x3] %vm82_vm1, %v81_v3  ;;  %v2356_v5 = vld [vmem:[#allocation8] sm:$0xff]  ;;  %v2366_v6 = vld [vmem:[#allocation7 + $0x38] sm:$0x1]  ;;  %v2370_v8 = vld [vmem:[#allocation7 + $0x30] sm:$0xff] }
  0x38   :  { %1809 = vmatpush3.msra.mxu1 %v2342_v1  ;;  %1839 = vmatpush3.msra.mxu0 %v2342_v1  ;;  %v2377_v9 = vld [vmem:[#allocation7 + $0x28] sm:$0xff]  ;;  %v2381_v10 = vld [vmem:[#allocation7 + $0x20] sm:$0xff]  ;;  %v2385_v11 = vld [vmem:[#allocation7 + $0x18] sm:$0xff]  ;;  %vm182_vm4 = vcmask 465920   ;;  %s2282_s21 = smov 64   ;;  %s2283_s22 = smov 96  }
  0x39   :  { %1810 = vmatprep.subr.mxu1 %v2280_v0  ;;  %1840 = vmatprep.subr.mxu0 %v2280_v0  ;;  %v2389_v12 = vld [vmem:[#allocation7 + $0x10] sm:$0xff]  ;;  %v2393_v13 = vld [vmem:[#allocation7 + $0x8] sm:$0xff]  ;;  %v2397_v14 = vld [vmem:[#allocation7] sm:$0xff]  ;;  %vm280_vm5 = vcmask 845568   ;;  %vm291_vm6 = vcmask 58368  }
  0x3a   :  { %1811 = vmatpush3.msra.mxu1 %v2344_v2  ;;  %1841 = vmatpush3.msra.mxu0 %v2344_v2  ;;  %v107_v15 = vld [vmem:[#allocation2] sm:$0x3]  ;;  %v301_v36 = vld [vmem:[#allocation2 + $0x2] sm:$0x3]  ;;  %v490_v55 = vld [vmem:[#allocation2 + $0x4] sm:$0x3] }
  0x3b   :  { %1812 = vmatprep.subr.mxu1 %v2280_v0  ;;  %1842 = vmatprep.subr.mxu0 %v2280_v0  ;;  %v2417_v18 = vld [vmem:[%s2756_s4] ss:$0 sm:$0xff]  ;;  %v2426_v26 = vld [vmem:[%s2756_s4 + $0x1] ss:$0 sm:$0xff]  ;;  %s2284_s4 = smov [#allocation11]  }
  0x3c   :  { %1813 = vmatpush3.msra.mxu1 %v2349_v4  ;;  %1843 = vmatpush3.msra.mxu0 %v2349_v4  ;;  %s1647_s23 = sshll.u32 %s2284_s4, 4  ;;  %s1648_s23 = int_to_ptr.vmem [resolvable:$true] %s1647_s23 }
  0x3d   :  { %1814 = vmatprep.subr.mxu1 %v2280_v0  ;;  %1844 = vmatprep.subr.mxu0 %v2280_v0  ;;  %s2222_s24 = scalar_lea.vmem %s1648_s23, 32  ;;  %p2227_p7 = scmp.lt.s32.totalorder %s1648_s23, %s1648_s23 }
  0x3e   :  { %1815 = vmatpush3.msra.mxu1 %v2356_v5  ;;  %1845 = vmatpush3.msra.mxu0 %v2356_v5  ;;  %v106_v7 = vld [vmem:[#allocation11] sm:$0x3]  ;;  %p2223_p6 = scmp.ne.s32.totalorder %s1648_s23, %s2222_s24  ;;  %p2228_p8 = scmp.lt.s32.totalorder %s2222_s24, %s2222_s24 }
  0x3f   :  { %1819 = vmatprep.subr.mxu1 %v2280_v0  ;;  %1849 = vmatprep.subr.mxu0 %v2280_v0 }
  0x40   :  { %1817 = vmatmul.mubr.msk.f32.vlgmr.msra.gmra.mxu1 %vm108_vm2, %v106_v7  ;;  %p2229_p9 = por %p2228_p8, %p2227_p7 }
  0x41   :  { %1820 = vmatpush3.msk.msra.mxu1 %vm186_vm3, %v2366_v6  ;;  %1835 = vmatprep.mubr.msk.f32.mxu1 %vm2281_vm0, %v2280_v0 }
  0x42   :  { %1821 = vmatprep.subr.mxu1 %v2280_v0  ;;  %p2230_p10 = pnand %p2229_p9, %p2223_p6 }
  0x43   :  { %1822 = vmatpush3.msra.mxu1 %v2370_v8 }
  0x44   :  { %1823 = vmatprep.subr.mxu1 %v2280_v0 }
  0x45   :  { %1824 = vmatpush3.msra.mxu1 %v2377_v9 }
  0x46   :  { %1825 = vmatprep.subr.mxu1 %v2280_v0 }
  0x47   :  { %1826 = vmatpush3.msra.mxu1 %v2381_v10 }
  0x48   :  { %1827 = vmatprep.subr.mxu1 %v2280_v0 }
  0x49   :  { %1828 = vmatpush3.msra.mxu1 %v2385_v11 }
  0x4a   :  { %1829 = vmatprep.subr.mxu1 %v2280_v0 }
  0x4b   :  { %1830 = vmatpush3.msra.mxu1 %v2389_v12 }
  0x4c   :  { %1831 = vmatprep.subr.mxu1 %v2280_v0 }
  0x4d   :  { %1832 = vmatpush3.msra.mxu1 %v2393_v13 }
  0x4e   :  { %1833 = vmatprep.subr.mxu1 %v2280_v0 }
  0x4f   :  { %1834 = vmatpush3.msra.mxu1 %v2397_v14 }
  0x50   :  { %1836 = vmatmul.mubr.msk.f32.vlgmr.msra.gmra.mxu1 %vm182_vm4, %v107_v15  ;;  %1868 = vmatprep.subr.mxu1 %v2280_v0 }
  0x51   :  { %1869 = vmatpush3.msra.mxu1 %v2342_v1  ;;  %1876 = vmatprep.mubr.msk.f32.mxu1 %vm2281_vm0, %v2280_v0 }
  0x52   :  { %1870 = vmatprep.subr.mxu1 %v2280_v0 }
  0x53   :  { %1871 = vmatpush3.msra.mxu1 %v2344_v2 }
  0x54   :  { %1872 = vmatprep.subr.mxu1 %v2280_v0 }
  0x55   :  { %1873 = vmatpush3.msra.mxu1 %v2349_v4 }
  0x56   :  { %1874 = vmatprep.subr.mxu1 %v2280_v0 }
  0x57   :  { %1875 = vmatpush3.msra.mxu1 %v2356_v5 }
  0x58   :  { %1879 = vmatprep.subr.mxu1 %v2280_v0 }
 0x100   :  { %v178_v16 = vpop.f32.mrf.mxu1 }
 0x102   :  { %v1818_v17 = vpop.f32.mrf.mxu1 }
 0x110   :  { %v256_v19 = vpop.f32.mrf.mxu1 }
 0x111   :  { %v257_v20 = vadd.f32 %v256_v19, %v178_v16 }
 0x112   :  { %v1837_v21 = vpop.f32.mrf.mxu1 }
 0x113   :  { %v2420_v22 = vadd.f32 %v2417_v18, %v257_v20 }
 0x115   :  { %v1667_v23 = vmul.f32 -1.442695, %v2420_v22 }
 0x117   :  { %2062 = vpow2.f32 %v1667_v23 }
 0x124   :  { %v2063_v24 = vpop.eup %2062 }
 0x125   :  { %v264_v25 = vadd.f32 1.0, %v2063_v24 }
 0x127   :  { %2064 = vrcp.f32 %v264_v25  ;;  %v679_v25 = vld [vmem:[#allocation2 + $0x6] sm:$0x3] }
 0x134   :  { %v2065_v27 = vpop.eup %2064 }
 0x135   :  { %v267_v28 = vmul.f32 %v2065_v27, %v2426_v26  ;;  %v274_v32 = vsub.f32 1.0, %v2065_v27 }
 0x137   :  { %269 = vrot.lane.b32.xlu0 %v267_v28, %s2282_s21 }
 0x1a9   :  { %v270_v29 = vpop.permute.xlu0 %269 }
 0x1aa   :  { %v272_v30 = vadd.f32 %v270_v29, %v2420_v22 }
 0x1ac   :  { %2066 = vtanh.f32 %v272_v30 }
 0x1b9   :  { %v2067_v31 = vpop.eup %2066 }
 0x1ba   :  { %276 = vrot.lane.b32.xlu0 %v2067_v31, %s2283_s22 }
 0x22c   :  { %v277_v33 = vpop.permute.xlu0 %276 }
 0x22d   :  { %v279_v34 = vmul.f32 %v277_v33, %v274_v32 }
 0x22f   :  { %303 = vrot.lane.b32.xlu1 %v279_v34, %s2283_s22 }
 0x2a1   :  { %v304_v35 = vpop.permute.xlu1 %303 }
 0x2a2   :  { %1847 = vmatmul.mubr.msk.f32.vlgmr.msra.gmra.mxu0 %vm108_vm2, %v304_v35 }
 0x2a3   :  { %1850 = vmatpush3.msk.msra.mxu0 %vm186_vm3, %v2366_v6  ;;  %1865 = vmatprep.mubr.msk.f32.mxu0 %vm2281_vm0, %v2280_v0 }
 0x2a4   :  { %1851 = vmatprep.subr.mxu0 %v2280_v0 }
 0x2a5   :  { %1852 = vmatpush3.msra.mxu0 %v2370_v8 }
 0x2a6   :  { %1853 = vmatprep.subr.mxu0 %v2280_v0 }
 0x2a7   :  { %1854 = vmatpush3.msra.mxu0 %v2377_v9 }
 0x2a8   :  { %1855 = vmatprep.subr.mxu0 %v2280_v0 }
 0x2a9   :  { %1856 = vmatpush3.msra.mxu0 %v2381_v10 }
 0x2aa   :  { %1857 = vmatprep.subr.mxu0 %v2280_v0 }
 0x2ab   :  { %1858 = vmatpush3.msra.mxu0 %v2385_v11 }
 0x2ac   :  { %1859 = vmatprep.subr.mxu0 %v2280_v0 }
 0x2ad   :  { %1860 = vmatpush3.msra.mxu0 %v2389_v12 }
 0x2ae   :  { %1861 = vmatprep.subr.mxu0 %v2280_v0 }
 0x2af   :  { %1862 = vmatpush3.msra.mxu0 %v2393_v13 }
 0x2b0   :  { %1863 = vmatprep.subr.mxu0 %v2280_v0 }
 0x2b1   :  { %1864 = vmatpush3.msra.mxu0 %v2397_v14 }
 0x2b2   :  { %1866 = vmatmul.mubr.msk.f32.vlgmr.msra.gmra.mxu0 %vm182_vm4, %v301_v36  ;;  %1898 = vmatprep.subr.mxu0 %v2280_v0 }
 0x2b3   :  { %1899 = vmatpush3.msra.mxu0 %v2342_v1  ;;  %1906 = vmatprep.mubr.msk.f32.mxu0 %vm2281_vm0, %v2280_v0 }
 0x2b4   :  { %1900 = vmatprep.subr.mxu0 %v2280_v0 }
 0x2b5   :  { %1901 = vmatpush3.msra.mxu0 %v2344_v2 }
 0x2b6   :  { %1902 = vmatprep.subr.mxu0 %v2280_v0 }
 0x2b7   :  { %1903 = vmatpush3.msra.mxu0 %v2349_v4 }
 0x2b8   :  { %1904 = vmatprep.subr.mxu0 %v2280_v0 }
 0x2b9   :  { %1905 = vmatpush3.msra.mxu0 %v2356_v5 }
 0x2ba   :  { %1909 = vmatprep.subr.mxu0 %v2280_v0 }
 0x362   :  { %v373_v37 = vpop.f32.mrf.mxu0 }
 0x364   :  { %v1848_v38 = vpop.f32.mrf.mxu0 }
 0x372   :  { %v446_v39 = vpop.f32.mrf.mxu0 }
 0x373   :  { %v447_v40 = vadd.f32 %v446_v39, %v373_v37 }
 0x374   :  { %v1867_v41 = vpop.f32.mrf.mxu0 }
 0x375   :  { %v2465_v42 = vadd.f32 %v2417_v18, %v447_v40 }
 0x377   :  { %v1671_v43 = vmul.f32 -1.442695, %v2465_v42 }
 0x379   :  { %2068 = vpow2.f32 %v1671_v43 }
 0x386   :  { %v2069_v44 = vpop.eup %2068 }
 0x387   :  { %v454_v45 = vadd.f32 1.0, %v2069_v44 }
 0x389   :  { %2070 = vrcp.f32 %v454_v45 }
 0x396   :  { %v2071_v46 = vpop.eup %2070 }
 0x397   :  { %v457_v47 = vmul.f32 %v2071_v46, %v2426_v26  ;;  %v464_v51 = vsub.f32 1.0, %v2071_v46  ;;  %v868_v46 = vld [vmem:[#allocation2 + $0x8] sm:$0x3] }
 0x399   :  { %459 = vrot.lane.b32.xlu1 %v457_v47, %s2282_s21 }
 0x40b   :  { %v460_v48 = vpop.permute.xlu1 %459 }
 0x40c   :  { %v462_v49 = vadd.f32 %v460_v48, %v2465_v42 }
 0x40e   :  { %2072 = vtanh.f32 %v462_v49 }
 0x41b   :  { %v2073_v50 = vpop.eup %2072 }
 0x41c   :  { %466 = vrot.lane.b32.xlu0 %v2073_v50, %s2283_s22 }
 0x48e   :  { %v467_v52 = vpop.permute.xlu0 %466 }
 0x48f   :  { %v469_v53 = vmul.f32 %v467_v52, %v464_v51 }
 0x491   :  { %492 = vrot.lane.b32.xlu1 %v469_v53, %s2283_s22 }
 0x503   :  { %v493_v54 = vpop.permute.xlu1 %492 }
 0x504   :  { %1877 = vmatmul.mubr.msk.f32.vlgmr.msra.gmra.mxu1 %vm108_vm2, %v493_v54 }
 0x505   :  { %1880 = vmatpush3.msk.msra.mxu1 %vm186_vm3, %v2366_v6  ;;  %1895 = vmatprep.mubr.msk.f32.mxu1 %vm2281_vm0, %v2280_v0 }
 0x506   :  { %1881 = vmatprep.subr.mxu1 %v2280_v0 }
 0x507   :  { %1882 = vmatpush3.msra.mxu1 %v2370_v8 }
 0x508   :  { %1883 = vmatprep.subr.mxu1 %v2280_v0 }
 0x509   :  { %1884 = vmatpush3.msra.mxu1 %v2377_v9 }
 0x50a   :  { %1885 = vmatprep.subr.mxu1 %v2280_v0 }
 0x50b   :  { %1886 = vmatpush3.msra.mxu1 %v2381_v10 }
 0x50c   :  { %1887 = vmatprep.subr.mxu1 %v2280_v0 }
 0x50d   :  { %1888 = vmatpush3.msra.mxu1 %v2385_v11 }
 0x50e   :  { %1889 = vmatprep.subr.mxu1 %v2280_v0 }
 0x50f   :  { %1890 = vmatpush3.msra.mxu1 %v2389_v12 }
 0x510   :  { %1891 = vmatprep.subr.mxu1 %v2280_v0 }
 0x511   :  { %1892 = vmatpush3.msra.mxu1 %v2393_v13 }
 0x512   :  { %1893 = vmatprep.subr.mxu1 %v2280_v0 }
 0x513   :  { %1894 = vmatpush3.msra.mxu1 %v2397_v14 }
 0x514   :  { %1896 = vmatmul.mubr.msk.f32.vlgmr.msra.gmra.mxu1 %vm182_vm4, %v490_v55  ;;  %1928 = vmatprep.subr.mxu1 %v2280_v0 }
 0x515   :  { %1929 = vmatpush3.msra.mxu1 %v2342_v1  ;;  %1936 = vmatprep.mubr.msk.f32.mxu1 %vm2281_vm0, %v2280_v0 }
 0x516   :  { %1930 = vmatprep.subr.mxu1 %v2280_v0 }
 0x517   :  { %1931 = vmatpush3.msra.mxu1 %v2344_v2 }
 0x518   :  { %1932 = vmatprep.subr.mxu1 %v2280_v0 }
 0x519   :  { %1933 = vmatpush3.msra.mxu1 %v2349_v4 }
 0x51a   :  { %1934 = vmatprep.subr.mxu1 %v2280_v0 }
 0x51b   :  { %1935 = vmatpush3.msra.mxu1 %v2356_v5 }
 0x51c   :  { %1939 = vmatprep.subr.mxu1 %v2280_v0 }
 0x5c4   :  { %v562_v56 = vpop.f32.mrf.mxu1 }
 0x5c6   :  { %v1878_v57 = vpop.f32.mrf.mxu1 }
 0x5d4   :  { %v635_v58 = vpop.f32.mrf.mxu1 }
 0x5d5   :  { %v636_v59 = vadd.f32 %v635_v58, %v562_v56 }
 0x5d6   :  { %v1897_v60 = vpop.f32.mrf.mxu1 }
 0x5d7   :  { %v2505_v61 = vadd.f32 %v2417_v18, %v636_v59 }
 0x5d9   :  { %v1675_v62 = vmul.f32 -1.442695, %v2505_v61 }
 0x5db   :  { %2074 = vpow2.f32 %v1675_v62 }
 0x5e8   :  { %v2075_v63 = vpop.eup %2074 }
 0x5e9   :  { %v643_v3 = vadd.f32 1.0, %v2075_v63 }
 0x5eb   :  { %2076 = vrcp.f32 %v643_v3 }
 0x5f8   :  { %v2077_v7 = vpop.eup %2076 }
 0x5f9   :  { %v646_v15 = vmul.f32 %v2077_v7, %v2426_v26  ;;  %v653_v20 = vsub.f32 1.0, %v2077_v7 }
 0x5fb   :  { %648 = vrot.lane.b32.xlu0 %v646_v15, %s2282_s21  ;;  %v1057_v15 = vld [vmem:[#allocation2 + $0xa] sm:$0x3] }
 0x66d   :  { %v649_v16 = vpop.permute.xlu0 %648 }
 0x66e   :  { %v651_v17 = vadd.f32 %v649_v16, %v2505_v61 }
 0x670   :  { %2078 = vtanh.f32 %v651_v17 }
 0x67d   :  { %v2079_v19 = vpop.eup %2078 }
 0x67e   :  { %655 = vrot.lane.b32.xlu1 %v2079_v19, %s2283_s22 }
 0x6f0   :  { %v656_v21 = vpop.permute.xlu1 %655 }
 0x6f1   :  { %v658_v23 = vmul.f32 %v656_v21, %v653_v20 }
 0x6f3   :  { %681 = vrot.lane.b32.xlu0 %v658_v23, %s2283_s22 }
 0x765   :  { %v682_v24 = vpop.permute.xlu0 %681 }
 0x766   :  { %1907 = vmatmul.mubr.msk.f32.vlgmr.msra.gmra.mxu0 %vm108_vm2, %v682_v24 }
 0x767   :  { %1910 = vmatpush3.msk.msra.mxu0 %vm186_vm3, %v2366_v6  ;;  %1925 = vmatprep.mubr.msk.f32.mxu0 %vm2281_vm0, %v2280_v0 }
 0x768   :  { %1911 = vmatprep.subr.mxu0 %v2280_v0 }
 0x769   :  { %1912 = vmatpush3.msra.mxu0 %v2370_v8 }
 0x76a   :  { %1913 = vmatprep.subr.mxu0 %v2280_v0 }
 0x76b   :  { %1914 = vmatpush3.msra.mxu0 %v2377_v9 }
 0x76c   :  { %1915 = vmatprep.subr.mxu0 %v2280_v0 }
 0x76d   :  { %1916 = vmatpush3.msra.mxu0 %v2381_v10 }
 0x76e   :  { %1917 = vmatprep.subr.mxu0 %v2280_v0 }
 0x76f   :  { %1918 = vmatpush3.msra.mxu0 %v2385_v11 }
 0x770   :  { %1919 = vmatprep.subr.mxu0 %v2280_v0 }
 0x771   :  { %1920 = vmatpush3.msra.mxu0 %v2389_v12 }
 0x772   :  { %1921 = vmatprep.subr.mxu0 %v2280_v0 }
 0x773   :  { %1922 = vmatpush3.msra.mxu0 %v2393_v13 }
 0x774   :  { %1923 = vmatprep.subr.mxu0 %v2280_v0 }
 0x775   :  { %1924 = vmatpush3.msra.mxu0 %v2397_v14 }
 0x776   :  { %1926 = vmatmul.mubr.msk.f32.vlgmr.msra.gmra.mxu0 %vm182_vm4, %v679_v25  ;;  %1958 = vmatprep.subr.mxu0 %v2280_v0 }
 0x777   :  { %1959 = vmatpush3.msra.mxu0 %v2342_v1  ;;  %1966 = vmatprep.mubr.msk.f32.mxu0 %vm2281_vm0, %v2280_v0 }
 0x778   :  { %1960 = vmatprep.subr.mxu0 %v2280_v0 }
 0x779   :  { %1961 = vmatpush3.msra.mxu0 %v2344_v2 }
 0x77a   :  { %1962 = vmatprep.subr.mxu0 %v2280_v0 }
 0x77b   :  { %1963 = vmatpush3.msra.mxu0 %v2349_v4 }
 0x77c   :  { %1964 = vmatprep.subr.mxu0 %v2280_v0 }
 0x77d   :  { %1965 = vmatpush3.msra.mxu0 %v2356_v5 }
 0x77e   :  { %1969 = vmatprep.subr.mxu0 %v2280_v0 }
 0x826   :  { %v751_v27 = vpop.f32.mrf.mxu0 }
 0x828   :  { %v1908_v28 = vpop.f32.mrf.mxu0 }
 0x836   :  { %v824_v29 = vpop.f32.mrf.mxu0 }
 0x837   :  { %v825_v30 = vadd.f32 %v824_v29, %v751_v27 }
 0x838   :  { %v1927_v31 = vpop.f32.mrf.mxu0 }
 0x839   :  { %v2545_v32 = vadd.f32 %v2417_v18, %v825_v30 }
 0x83b   :  { %v1679_v33 = vmul.f32 -1.442695, %v2545_v32 }
 0x83d   :  { %2080 = vpow2.f32 %v1679_v33 }
 0x84a   :  { %v2081_v34 = vpop.eup %2080 }
 0x84b   :  { %v832_v35 = vadd.f32 1.0, %v2081_v34  ;;  %v1246_v34 = vld [vmem:[#allocation2 + $0xc] sm:$0x3] }
 0x84d   :  { %2082 = vrcp.f32 %v832_v35 }
 0x85a   :  { %v2083_v36 = vpop.eup %2082 }
 0x85b   :  { %v835_v37 = vmul.f32 %v2083_v36, %v2426_v26  ;;  %v842_v41 = vsub.f32 1.0, %v2083_v36 }
 0x85d   :  { %837 = vrot.lane.b32.xlu1 %v835_v37, %s2282_s21 }
 0x8cf   :  { %v838_v38 = vpop.permute.xlu1 %837 }
 0x8d0   :  { %v840_v39 = vadd.f32 %v838_v38, %v2545_v32 }
 0x8d2   :  { %2084 = vtanh.f32 %v840_v39 }
 0x8df   :  { %v2085_v40 = vpop.eup %2084 }
 0x8e0   :  { %844 = vrot.lane.b32.xlu0 %v2085_v40, %s2283_s22 }
 0x952   :  { %v845_v43 = vpop.permute.xlu0 %844 }
 0x953   :  { %v847_v44 = vmul.f32 %v845_v43, %v842_v41 }
 0x955   :  { %870 = vrot.lane.b32.xlu1 %v847_v44, %s2283_s22 }
 0x9c7   :  { %v871_v45 = vpop.permute.xlu1 %870 }
 0x9c8   :  { %1937 = vmatmul.mubr.msk.f32.vlgmr.msra.gmra.mxu1 %vm108_vm2, %v871_v45 }
 0x9c9   :  { %1940 = vmatpush3.msk.msra.mxu1 %vm186_vm3, %v2366_v6  ;;  %1955 = vmatprep.mubr.msk.f32.mxu1 %vm2281_vm0, %v2280_v0 }
 0x9ca   :  { %1941 = vmatprep.subr.mxu1 %v2280_v0 }
 0x9cb   :  { %1942 = vmatpush3.msra.mxu1 %v2370_v8 }
 0x9cc   :  { %1943 = vmatprep.subr.mxu1 %v2280_v0 }
 0x9cd   :  { %1944 = vmatpush3.msra.mxu1 %v2377_v9 }
 0x9ce   :  { %1945 = vmatprep.subr.mxu1 %v2280_v0 }
 0x9cf   :  { %1946 = vmatpush3.msra.mxu1 %v2381_v10 }
 0x9d0   :  { %1947 = vmatprep.subr.mxu1 %v2280_v0 }
 0x9d1   :  { %1948 = vmatpush3.msra.mxu1 %v2385_v11 }
 0x9d2   :  { %1949 = vmatprep.subr.mxu1 %v2280_v0 }
 0x9d3   :  { %1950 = vmatpush3.msra.mxu1 %v2389_v12 }
 0x9d4   :  { %1951 = vmatprep.subr.mxu1 %v2280_v0 }
 0x9d5   :  { %1952 = vmatpush3.msra.mxu1 %v2393_v13 }
 0x9d6   :  { %1953 = vmatprep.subr.mxu1 %v2280_v0 }
 0x9d7   :  { %1954 = vmatpush3.msra.mxu1 %v2397_v14 }
 0x9d8   :  { %1956 = vmatmul.mubr.msk.f32.vlgmr.msra.gmra.mxu1 %vm182_vm4, %v868_v46  ;;  %1988 = vmatprep.subr.mxu1 %v2280_v0 }
 0x9d9   :  { %1989 = vmatpush3.msra.mxu1 %v2342_v1  ;;  %1996 = vmatprep.mubr.msk.f32.mxu1 %vm2281_vm0, %v2280_v0 }
 0x9da   :  { %1990 = vmatprep.subr.mxu1 %v2280_v0 }
 0x9db   :  { %1991 = vmatpush3.msra.mxu1 %v2344_v2 }
 0x9dc   :  { %1992 = vmatprep.subr.mxu1 %v2280_v0 }
 0x9dd   :  { %1993 = vmatpush3.msra.mxu1 %v2349_v4 }
 0x9de   :  { %1994 = vmatprep.subr.mxu1 %v2280_v0 }
 0x9df   :  { %1995 = vmatpush3.msra.mxu1 %v2356_v5 }
 0x9e0   :  { %1999 = vmatprep.subr.mxu1 %v2280_v0 }
 0xa88   :  { %v940_v47 = vpop.f32.mrf.mxu1 }
 0xa8a   :  { %v1938_v48 = vpop.f32.mrf.mxu1 }
 0xa98   :  { %v1013_v49 = vpop.f32.mrf.mxu1 }
 0xa99   :  { %v1014_v50 = vadd.f32 %v1013_v49, %v940_v47 }
 0xa9a   :  { %v1957_v51 = vpop.f32.mrf.mxu1 }
 0xa9b   :  { %v2585_v52 = vadd.f32 %v2417_v18, %v1014_v50  ;;  %v281_v50 = vsel %vm280_vm5, %v2420_v22, -inf  ;;  %v470_v51 = vsel %vm280_vm5, %v2465_v42, -inf }
 0xa9d   :  { %v1683_v53 = vmul.f32 -1.442695, %v2585_v52 }
 0xa9f   :  { %2086 = vpow2.f32 %v1683_v53 }
 0xaac   :  { %v2087_v54 = vpop.eup %2086 }
 0xaad   :  { %v1021_v55 = vadd.f32 1.0, %v2087_v54 }
 0xaaf   :  { %2088 = vrcp.f32 %v1021_v55 }
 0xabc   :  { %v2089_v56 = vpop.eup %2088 }
 0xabd   :  { %v1024_v57 = vmul.f32 %v2089_v56, %v2426_v26  ;;  %v1031_v62 = vsub.f32 1.0, %v2089_v56 }
 0xabf   :  { %1026 = vrot.lane.b32.xlu0 %v1024_v57, %s2282_s21 }
 0xb31   :  { %v1027_v58 = vpop.permute.xlu0 %1026 }
 0xb32   :  { %v1029_v59 = vadd.f32 %v1027_v58, %v2585_v52 }
 0xb34   :  { %2090 = vtanh.f32 %v1029_v59 }
 0xb41   :  { %v2091_v60 = vpop.eup %2090 }
 0xb42   :  { %1033 = vrot.lane.b32.xlu1 %v2091_v60, %s2283_s22 }
 0xbb4   :  { %v1034_v63 = vpop.permute.xlu1 %1033 }
 0xbb5   :  { %v1036_v3 = vmul.f32 %v1034_v63, %v1031_v62 }
 0xbb7   :  { %1059 = vrot.lane.b32.xlu0 %v1036_v3, %s2283_s22 }
 0xc29   :  { %v1060_v7 = vpop.permute.xlu0 %1059 }
 0xc2a   :  { %1967 = vmatmul.mubr.msk.f32.vlgmr.msra.gmra.mxu0 %vm108_vm2, %v1060_v7 }
 0xc2b   :  { %1970 = vmatpush3.msk.msra.mxu0 %vm186_vm3, %v2366_v6  ;;  %1985 = vmatprep.mubr.msk.f32.mxu0 %vm2281_vm0, %v2280_v0 }
 0xc2c   :  { %1971 = vmatprep.subr.mxu0 %v2280_v0 }
 0xc2d   :  { %1972 = vmatpush3.msra.mxu0 %v2370_v8 }
 0xc2e   :  { %1973 = vmatprep.subr.mxu0 %v2280_v0 }
 0xc2f   :  { %1974 = vmatpush3.msra.mxu0 %v2377_v9 }
 0xc30   :  { %1975 = vmatprep.subr.mxu0 %v2280_v0 }
 0xc31   :  { %1976 = vmatpush3.msra.mxu0 %v2381_v10 }
 0xc32   :  { %1977 = vmatprep.subr.mxu0 %v2280_v0 }
 0xc33   :  { %1978 = vmatpush3.msra.mxu0 %v2385_v11 }
 0xc34   :  { %1979 = vmatprep.subr.mxu0 %v2280_v0 }
 0xc35   :  { %1980 = vmatpush3.msra.mxu0 %v2389_v12 }
 0xc36   :  { %1981 = vmatprep.subr.mxu0 %v2280_v0 }
 0xc37   :  { %1982 = vmatpush3.msra.mxu0 %v2393_v13 }
 0xc38   :  { %1983 = vmatprep.subr.mxu0 %v2280_v0 }
 0xc39   :  { %1984 = vmatpush3.msra.mxu0 %v2397_v14 }
 0xc3a   :  { %1986 = vmatmul.mubr.msk.f32.vlgmr.msra.gmra.mxu0 %vm182_vm4, %v1057_v15  ;;  %2018 = vmatprep.subr.mxu0 %v2280_v0 }
 0xc3b   :  { %2019 = vmatpush3.msra.mxu0 %v2342_v1  ;;  %2026 = vmatprep.mubr.msk.f32.mxu0 %vm2281_vm0, %v2280_v0 }
 0xc3c   :  { %2020 = vmatprep.subr.mxu0 %v2280_v0 }
 0xc3d   :  { %2021 = vmatpush3.msra.mxu0 %v2344_v2 }
 0xc3e   :  { %2022 = vmatprep.subr.mxu0 %v2280_v0 }
 0xc3f   :  { %2023 = vmatpush3.msra.mxu0 %v2349_v4 }
 0xc40   :  { %2024 = vmatprep.subr.mxu0 %v2280_v0 }
 0xc41   :  { %2025 = vmatpush3.msra.mxu0 %v2356_v5 }
 0xc42   :  { %2029 = vmatprep.subr.mxu0 %v2280_v0 }
 0xcea   :  { %v1129_v16 = vpop.f32.mrf.mxu0 }
 0xcec   :  { %v1968_v17 = vpop.f32.mrf.mxu0 }
 0xced   :  { %v659_v17 = vsel %vm280_vm5, %v2505_v61, -inf }
 0xcfa   :  { %v1202_v1 = vpop.f32.mrf.mxu0 }
 0xcfb   :  { %v1203_v19 = vadd.f32 %v1202_v1, %v1129_v16 }
 0xcfc   :  { %v1987_v20 = vpop.f32.mrf.mxu0 }
 0xcfd   :  { %v2625_v21 = vadd.f32 %v2417_v18, %v1203_v19 }
 0xcff   :  { %v1687_v2 = vmul.f32 -1.442695, %v2625_v21 }
 0xd01   :  { %2092 = vpow2.f32 %v1687_v2 }
 0xd0e   :  { %v2093_v23 = vpop.eup %2092 }
 0xd0f   :  { %v1210_v24 = vadd.f32 1.0, %v2093_v23 }
 0xd11   :  { %2094 = vrcp.f32 %v1210_v24 }
 0xd1e   :  { %v2095_v4 = vpop.eup %2094 }
 0xd1f   :  { %v1213_v25 = vmul.f32 %v2095_v4, %v2426_v26  ;;  %v1220_v29 = vsub.f32 1.0, %v2095_v4 }
 0xd21   :  { %1215 = vrot.lane.b32.xlu1 %v1213_v25, %s2282_s21 }
 0xd93   :  { %v1216_v5 = vpop.permute.xlu1 %1215 }
 0xd94   :  { %v1218_v27 = vadd.f32 %v1216_v5, %v2625_v21 }
 0xd96   :  { %2096 = vtanh.f32 %v1218_v27 }
 0xda3   :  { %v2097_v28 = vpop.eup %2096 }
 0xda4   :  { %1222 = vrot.lane.b32.xlu0 %v2097_v28, %s2283_s22 }
 0xe16   :  { %v1223_v30 = vpop.permute.xlu0 %1222 }
 0xe17   :  { %v1225_v31 = vmul.f32 %v1223_v30, %v1220_v29 }
 0xe19   :  { %1248 = vrot.lane.b32.xlu1 %v1225_v31, %s2283_s22 }
 0xe8b   :  { %v1249_v33 = vpop.permute.xlu1 %1248 }
 0xe8c   :  { %1997 = vmatmul.mubr.msk.f32.vlgmr.msra.gmra.mxu1 %vm108_vm2, %v1249_v33 }
 0xe8d   :  { %2000 = vmatpush3.msk.msra.mxu1 %vm186_vm3, %v2366_v6  ;;  %2015 = vmatprep.mubr.msk.f32.mxu1 %vm2281_vm0, %v2280_v0 }
 0xe8e   :  { %2001 = vmatprep.subr.mxu1 %v2280_v0 }
 0xe8f   :  { %2002 = vmatpush3.msra.mxu1 %v2370_v8 }
 0xe90   :  { %2003 = vmatprep.subr.mxu1 %v2280_v0 }
 0xe91   :  { %2004 = vmatpush3.msra.mxu1 %v2377_v9 }
 0xe92   :  { %2005 = vmatprep.subr.mxu1 %v2280_v0 }
 0xe93   :  { %2006 = vmatpush3.msra.mxu1 %v2381_v10 }
 0xe94   :  { %2007 = vmatprep.subr.mxu1 %v2280_v0 }
 0xe95   :  { %2008 = vmatpush3.msra.mxu1 %v2385_v11 }
 0xe96   :  { %2009 = vmatprep.subr.mxu1 %v2280_v0 }
 0xe97   :  { %2010 = vmatpush3.msra.mxu1 %v2389_v12 }
 0xe98   :  { %2011 = vmatprep.subr.mxu1 %v2280_v0 }
 0xe99   :  { %2012 = vmatpush3.msra.mxu1 %v2393_v13 }
 0xe9a   :  { %2013 = vmatprep.subr.mxu1 %v2280_v0 }
 0xe9b   :  { %2014 = vmatpush3.msra.mxu1 %v2397_v14 }
 0xe9c   :  { %2016 = vmatmul.mubr.msk.f32.vlgmr.msra.gmra.mxu1 %vm182_vm4, %v1246_v34 }
 0xf4c   :  { %v1318_v35 = vpop.f32.mrf.mxu1 }
 0xf4e   :  { %v1998_v36 = vpop.f32.mrf.mxu1 }
 0xf5c   :  { %v1391_v37 = vpop.f32.mrf.mxu1 }
 0xf5d   :  { %v1392_v38 = vadd.f32 %v1391_v37, %v1318_v35 }
 0xf5e   :  { %v2017_v39 = vpop.f32.mrf.mxu1 }
 0xf5f   :  { %v2654_v40 = vadd.f32 %v2417_v18, %v1392_v38 }
 0xf61   :  { %v1691_v41 = vmul.f32 -1.442695, %v2654_v40 }
 0xf63   :  { %2098 = vpow2.f32 %v1691_v41 }
 0xf70   :  { %v2099_v43 = vpop.eup %2098 }
 0xf71   :  { %v1399_v44 = vadd.f32 1.0, %v2099_v43 }
 0xf73   :  { %2100 = vrcp.f32 %v1399_v44 }
 0xf80   :  { %v2101_v45 = vpop.eup %2100 }
 0xf81   :  { %v1402_v46 = vmul.f32 %v2101_v45, %v2426_v26  ;;  %v1409_v53 = vsub.f32 1.0, %v2101_v45 }
 0xf83   :  { %1404 = vrot.lane.b32.xlu0 %v1402_v46, %s2282_s21  ;;  %v1037_v46 = vsel %vm280_vm5, %v2585_v52, -inf }
 0xff5   :  { %v1405_v47 = vpop.permute.xlu0 %1404 }
 0xff6   :  { %v1407_v48 = vadd.f32 %v1405_v47, %v2654_v40 }
 0xff8   :  { %2102 = vtanh.f32 %v1407_v48 }
0x1005   :  { %v2103_v49 = vpop.eup %2102 }
0x1006   :  { %1411 = vrot.lane.b32.xlu1 %v2103_v49, %s2283_s22 }
0x102a   :  { %282 = vmax.xlane.f32.xlu1 %v281_v50 }
0x102e   :  { %471 = vmax.xlane.f32.xlu1 %v470_v51 }
0x1078   :  { %v1412_v54 = vpop.permute.xlu1 %1411 }
0x1079   :  { %v1414_v55 = vmul.f32 %v1412_v54, %v1409_v53 }
0x107b   :  { %1437 = vrot.lane.b32.xlu0 %v1414_v55, %s2283_s22 }
0x10b3   :  { %v283_v56 = vpop.xlane.xlu1 %282 }
0x10b4   :  { %v284_v57 = vsub.f32 %v2420_v22, %v283_v56 }
0x10b6   :  { %v285_v58 = vmul.f32 1.442695, %v284_v57 }
0x10b8   :  { %2104 = vpow2.f32 %v285_v58 }
0x10c5   :  { %v2105_v59 = vpop.eup %2104 }
0x10c6   :  { %288 = vrot.lane.b32.xlu0 %v2105_v59, %s2274_s29 }
0x10ed   :  { %v1438_v60 = vpop.permute.xlu0 %1437 }
0x10ee   :  { %2027 = vmatmul.mubr.msk.f32.vlgmr.msra.gmra.mxu0 %vm108_vm2, %v1438_v60 }
0x10ef   :  { %2030 = vmatpush3.msk.msra.mxu0 %vm186_vm3, %v2366_v6  ;;  %2045 = vmatprep.mubr.msk.f32.mxu0 %vm2281_vm0, %v2280_v0  ;;  %v1435_v6 = vld [vmem:[#allocation2 + $0xe] sm:$0x3] }
0x10f0   :  { %2031 = vmatprep.subr.mxu0 %v2280_v0 }
0x10f1   :  { %2032 = vmatpush3.msra.mxu0 %v2370_v8  ;;  %v472_v8 = vpop.xlane.xlu1 %471 }
0x10f2   :  { %2033 = vmatprep.subr.mxu0 %v2280_v0 }
0x10f3   :  { %2034 = vmatpush3.msra.mxu0 %v2377_v9 }
0x10f4   :  { %2035 = vmatprep.subr.mxu0 %v2280_v0 }
0x10f5   :  { %2036 = vmatpush3.msra.mxu0 %v2381_v10 }
0x10f6   :  { %2037 = vmatprep.subr.mxu0 %v2280_v0 }
0x10f7   :  { %2038 = vmatpush3.msra.mxu0 %v2385_v11  ;;  %v473_v11 = vsub.f32 %v2465_v42, %v472_v8 }
0x10f8   :  { %2039 = vmatprep.subr.mxu0 %v2280_v0 }
0x10f9   :  { %2040 = vmatpush3.msra.mxu0 %v2389_v12  ;;  %v474_v12 = vmul.f32 1.442695, %v473_v11 }
0x10fa   :  { %2041 = vmatprep.subr.mxu0 %v2280_v0 }
0x10fb   :  { %2042 = vmatpush3.msra.mxu0 %v2393_v13  ;;  %2106 = vpow2.f32 %v474_v12 }
0x10fc   :  { %2043 = vmatprep.subr.mxu0 %v2280_v0 }
0x10fd   :  { %2044 = vmatpush3.msra.mxu0 %v2397_v14 }
0x10fe   :  { %2046 = vmatmul.mubr.msk.f32.vlgmr.msra.gmra.mxu0 %vm182_vm4, %v1435_v6 }
0x1108   :  { %v2107_v62 = vpop.eup %2106 }
0x1138   :  { %v289_v9 = vpop.permute.xlu0 %288 }
0x1139   :  { %v292_v10 = vsel %vm291_vm6, %v289_v9, 0.0 }
0x113a   :  { %293 = vadd.xlane.f32.xlu0 %v292_v10 }
0x1150   :  { %477 = vrot.lane.b32.xlu0 %v2107_v62, %s2274_s29 }
0x11ae   :  { %v1507_v13 = vpop.f32.mrf.mxu0 }
0x11b0   :  { %v2028_v63 = vpop.f32.mrf.mxu0 }
0x11be   :  { %v1580_v0 = vpop.f32.mrf.mxu0 }
0x11bf   :  { %v2691_v3 = vadd.f32 %v1580_v0, %v1507_v13 }
0x11c0   :  { %v2047_v14 = vpop.f32.mrf.mxu0 }
0x11c3   :  { %v294_v7 = vpop.xlane.xlu0 %293 }
0x11c4   :  { %2108 = vlog2.f32 %v294_v7 }
0x11c7   :  { %v478_v15 = vpop.permute.xlu0 %477 }
0x11c8   :  { %v480_v16 = vsel %vm291_vm6, %v478_v15, 0.0 }
0x11c9   :  { %481 = vadd.xlane.f32.xlu1 %v480_v16  ;;  %v1415_v16 = vsel %vm280_vm5, %v2654_v40, -inf }
0x11cd   :  { %660 = vmax.xlane.f32.xlu1 %v659_v17 }
0x11d1   :  { %v2109_v1 = vpop.eup %2108 }
0x11d2   :  { %v296_v19 = vmul.f32 0.6931472, %v2109_v1 }
0x11d4   :  { %v297_v20 = vadd.f32 %v296_v19, %v283_v56  ;;  %v1226_v56 = vsel %vm280_vm5, %v2625_v21, -inf }
0x11d6   :  { %v298_v2 = vsub.f32 %v2420_v22, %v297_v20  ;;  %v848_v22 = vsel %vm280_vm5, %v2545_v32, -inf }
0x11d8   :  { %299 = vst [vmem:[#allocation10] sm:$0x3] %v298_v2 }
0x1252   :  { %v482_v23 = vpop.xlane.xlu1 %481 }
0x1253   :  { %2110 = vlog2.f32 %v482_v23 }
0x1256   :  { %v661_v24 = vpop.xlane.xlu1 %660 }
0x1257   :  { %v662_v4 = vsub.f32 %v2505_v61, %v661_v24 }
0x1259   :  { %v663_v25 = vmul.f32 1.442695, %v662_v4 }
0x125b   :  { %2112 = vpow2.f32 %v663_v25 }
0x1260   :  { %v2111_v5 = vpop.eup %2110 }
0x1261   :  { %v484_v27 = vmul.f32 0.6931472, %v2111_v5 }
0x1263   :  { %v485_v28 = vadd.f32 %v484_v27, %v472_v8 }
0x1265   :  { %v486_v29 = vsub.f32 %v2465_v42, %v485_v28 }
0x1267   :  { %488 = vst [vmem:[#allocation10 + $0x2] sm:$0x3] %v486_v29 }
0x1268   :  { %v2113_v30 = vpop.eup %2112 }
0x1269   :  { %666 = vrot.lane.b32.xlu1 %v2113_v30, %s2274_s29 }
0x128d   :  { %849 = vmax.xlane.f32.xlu1 %v848_v22 }
0x12db   :  { %v667_v31 = vpop.permute.xlu1 %666 }
0x12dc   :  { %v669_v33 = vsel %vm291_vm6, %v667_v31, 0.0 }
0x12dd   :  { %670 = vadd.xlane.f32.xlu0 %v669_v33 }
0x1316   :  { %v850_v34 = vpop.xlane.xlu1 %849 }
0x1317   :  { %v851_v35 = vsub.f32 %v2545_v32, %v850_v34 }
0x1319   :  { %v852_v36 = vmul.f32 1.442695, %v851_v35 }
0x131b   :  { %2114 = vpow2.f32 %v852_v36 }
0x1328   :  { %v2115_v37 = vpop.eup %2114 }
0x1329   :  { %855 = vrot.lane.b32.xlu0 %v2115_v37, %s2274_s29 }
0x1366   :  { %v671_v42 = vpop.xlane.xlu0 %670 }
0x1367   :  { %2116 = vlog2.f32 %v671_v42 }
0x1374   :  { %v2117_v38 = vpop.eup %2116 }
0x1375   :  { %v673_v39 = vmul.f32 0.6931472, %v2117_v38 }
0x1377   :  { %v674_v41 = vadd.f32 %v673_v39, %v661_v24 }
0x1379   :  { %v675_v43 = vsub.f32 %v2505_v61, %v674_v41 }
0x137b   :  { %677 = vst [vmem:[#allocation10 + $0x4] sm:$0x3] %v675_v43 }
0x139b   :  { %v856_v44 = vpop.permute.xlu0 %855 }
0x139c   :  { %v858_v45 = vsel %vm291_vm6, %v856_v44, 0.0 }
0x139d   :  { %859 = vadd.xlane.f32.xlu1 %v858_v45 }
0x13a1   :  { %1038 = vmax.xlane.f32.xlu1 %v1037_v46 }
0x1426   :  { %v860_v47 = vpop.xlane.xlu1 %859 }
0x1427   :  { %2118 = vlog2.f32 %v860_v47 }
0x142a   :  { %v1039_v48 = vpop.xlane.xlu1 %1038 }
0x142b   :  { %v1040_v49 = vsub.f32 %v2585_v52, %v1039_v48 }
0x142d   :  { %v1041_v50 = vmul.f32 1.442695, %v1040_v49 }
0x142f   :  { %2120 = vpow2.f32 %v1041_v50 }
0x1434   :  { %v2119_v51 = vpop.eup %2118 }
0x1435   :  { %v862_v53 = vmul.f32 0.6931472, %v2119_v51 }
0x1437   :  { %v863_v54 = vadd.f32 %v862_v53, %v850_v34 }
0x1439   :  { %v864_v61 = vsub.f32 %v2545_v32, %v863_v54  ;;  %v2719_v32 = vadd.f32 %v2417_v18, %v2691_v3 }
0x143b   :  { %866 = vst [vmem:[#allocation10 + $0x6] sm:$0x3] %v864_v61  ;;  %v1695_v9 = vmul.f32 -1.442695, %v2719_v32  ;;  %v1604_v11 = vsel %vm280_vm5, %v2719_v32, -inf }
0x143c   :  { %v2121_v55 = vpop.eup %2120 }
0x143d   :  { %1044 = vrot.lane.b32.xlu1 %v2121_v55, %s2274_s29 }
0x1461   :  { %1227 = vmax.xlane.f32.xlu1 %v1226_v56 }
0x14af   :  { %v1045_v57 = vpop.permute.xlu1 %1044 }
0x14b0   :  { %v1047_v58 = vsel %vm291_vm6, %v1045_v57, 0.0 }
0x14b1   :  { %1048 = vadd.xlane.f32.xlu0 %v1047_v58 }
0x14ea   :  { %v1228_v59 = vpop.xlane.xlu1 %1227 }
0x14eb   :  { %v1229_v60 = vsub.f32 %v2625_v21, %v1228_v59 }
0x14ed   :  { %v1230_v6 = vmul.f32 1.442695, %v1229_v60 }
0x14ef   :  { %2122 = vpow2.f32 %v1230_v6 }
0x14f0   :  { %2124 = vpow2.f32 %v1695_v9 }
0x14fc   :  { %v2123_v8 = vpop.eup %2122 }
0x14fd   :  { %1233 = vrot.lane.b32.xlu0 %v2123_v8, %s2274_s29  ;;  %v2125_v10 = vpop.eup %2124 }
0x14fe   :  { %v1588_v12 = vadd.f32 1.0, %v2125_v10 }
0x1500   :  { %2126 = vrcp.f32 %v1588_v12 }
0x150d   :  { %v2127_v62 = vpop.eup %2126 }
0x150e   :  { %v1591_v13 = vmul.f32 %v2127_v62, %v2426_v26  ;;  %v1598_v34 = vsub.f32 1.0, %v2127_v62 }
0x151c   :  { %1605 = vmax.xlane.f32.xlu0 %v1604_v11 }
0x1532   :  { %1593 = vrot.lane.b32.xlu0 %v1591_v13, %s2282_s21 }
0x153a   :  { %v1049_v63 = vpop.xlane.xlu0 %1048 }
0x153b   :  { %2128 = vlog2.f32 %v1049_v63 }
0x1548   :  { %v2129_v0 = vpop.eup %2128 }
0x1549   :  { %v1051_v18 = vmul.f32 0.6931472, %v2129_v0 }
0x154b   :  { %v1052_v3 = vadd.f32 %v1051_v18, %v1039_v48 }
0x154d   :  { %v1053_v14 = vsub.f32 %v2585_v52, %v1052_v3 }
0x154f   :  { %1055 = vst [vmem:[#allocation10 + $0x8] sm:$0x3] %v1053_v14 }
0x156f   :  { %v1234_v7 = vpop.permute.xlu0 %1233 }
0x1570   :  { %v1236_v15 = vsel %vm291_vm6, %v1234_v7, 0.0 }
0x1571   :  { %1237 = vadd.xlane.f32.xlu1 %v1236_v15 }
0x1575   :  { %1416 = vmax.xlane.f32.xlu1 %v1415_v16 }
0x15a5   :  { %v1606_v17 = vpop.xlane.xlu0 %1605 }
0x15a6   :  { %v1607_v28 = vsub.f32 %v2719_v32, %v1606_v17 }
0x15a8   :  { %v1608_v30 = vmul.f32 1.442695, %v1607_v28 }
0x15a9   :  { %v1594_v26 = vpop.permute.xlu0 %1593 }
0x15aa   :  { %v1596_v1 = vadd.f32 %v1594_v26, %v2719_v32 }
0x15ac   :  { %2130 = vtanh.f32 %v1596_v1 }
0x15b9   :  { %v2131_v19 = vpop.eup %2130 }
0x15ba   :  { %1600 = vrot.lane.b32.xlu0 %v2131_v19, %s2283_s22 }
0x15fa   :  { %v1238_v20 = vpop.xlane.xlu1 %1237 }
0x15fb   :  { %2132 = vlog2.f32 %v1238_v20 }
0x15fe   :  { %v1417_v52 = vpop.xlane.xlu1 %1416 }
0x15ff   :  { %v1418_v2 = vsub.f32 %v2654_v40, %v1417_v52 }
0x1601   :  { %v1419_v23 = vmul.f32 1.442695, %v1418_v2 }
0x1603   :  { %2134 = vpow2.f32 %v1419_v23 }
0x1604   :  { %2136 = vpow2.f32 %v1608_v30 }
0x1608   :  { %v2133_v24 = vpop.eup %2132 }
0x1609   :  { %v1240_v4 = vmul.f32 0.6931472, %v2133_v24 }
0x160b   :  { %v1241_v25 = vadd.f32 %v1240_v4, %v1228_v59 }
0x160d   :  { %v1242_v5 = vsub.f32 %v2625_v21, %v1241_v25 }
0x160f   :  { %1244 = vst [vmem:[#allocation10 + $0xa] sm:$0x3] %v1242_v5 }
0x1610   :  { %v2135_v27 = vpop.eup %2134 }
0x1611   :  { %1422 = vrot.lane.b32.xlu1 %v2135_v27, %s2274_s29  ;;  %v2137_v31 = vpop.eup %2136 }
0x162c   :  { %v1601_v33 = vpop.permute.xlu0 %1600 }
0x162d   :  { %v1603_v35 = vmul.f32 %v1601_v33, %v1598_v34 }
0x1683   :  { %v1423_v29 = vpop.permute.xlu1 %1422 }
0x1684   :  { %v1425_v22 = vsel %vm291_vm6, %v1423_v29, 0.0 }
0x1685   :  { %1426 = vadd.xlane.f32.xlu1 %v1425_v22 }
0x1696   :  { %1611 = vrot.lane.b32.xlu1 %v2137_v31, %s2274_s29 }
0x169a   :  { %1624 = vrot.lane.b32.xlu1 %v1603_v35, %s2283_s22 }
0x170e   :  { %v1427_v21 = vpop.xlane.xlu1 %1426 }
0x170f   :  { %2138 = vlog2.f32 %v1427_v21 }
0x1712   :  { %v1612_v36 = vpop.permute.xlu1 %1611 }
0x1713   :  { %v1614_v37 = vsel %vm291_vm6, %v1612_v36, 0.0 }
0x1714   :  { %1615 = vadd.xlane.f32.xlu0 %v1614_v37 }
0x1716   :  { %v1625_v42 = vpop.permute.xlu1 %1624 }
0x1717   :  { %1628 = vst.msk [vmem:[#allocation11] sm:$0x3] %vm82_vm1, %v1625_v42 }
0x171c   :  { %v2139_v38 = vpop.eup %2138 }
0x171d   :  { %v1429_v39 = vmul.f32 0.6931472, %v2139_v38 }
0x171f   :  { %v1430_v41 = vadd.f32 %v1429_v39, %v1417_v52 }
0x1721   :  { %v1431_v43 = vsub.f32 %v2654_v40, %v1430_v41 }
0x1723   :  { %1433 = vst [vmem:[#allocation10 + $0xc] sm:$0x3] %v1431_v43 }
0x1724   :  { %2233 = shalt.err (!%p2230_p10)
}
0x1725   :  { %1650 = dma.vmem_to_hbm [thread:$0]  %s1648_s23, 32, %s2758_s6, [#allocation12]  }
0x1726   :  { %s2285_s27 = smov [#allocation10]  }
0x1727   :  { %s1634_s28 = sshll.u32 %s2285_s27, 4  ;;  %s1635_s28 = int_to_ptr.vmem [resolvable:$true] %s1634_s28 }
0x1728   :  { %s2242_s7 = scalar_lea.vmem %s1635_s28, 256  ;;  %p2247_p12 = scmp.lt.s32.totalorder %s1635_s28, %s1635_s28 }
0x1729   :  { %p2243_p11 = scmp.ne.s32.totalorder %s1635_s28, %s2242_s7  ;;  %p2248_p13 = scmp.lt.s32.totalorder %s2242_s7, %s2242_s7 }
0x172b   :  { %p2249_p0 = por %p2248_p13, %p2247_p12 }
0x172d   :  { %p2250_p1 = pnand %p2249_p0, %p2243_p11 }
0x179d   :  { %v1616_v44 = vpop.xlane.xlu0 %1615 }
0x179e   :  { %2140 = vlog2.f32 %v1616_v44 }
0x17ab   :  { %v2141_v45 = vpop.eup %2140 }
0x17ac   :  { %v1618_v46 = vmul.f32 0.6931472, %v2141_v45 }
0x17ae   :  { %v1619_v40 = vadd.f32 %v1618_v46, %v1606_v17 }
0x17b0   :  { %v1620_v47 = vsub.f32 %v2719_v32, %v1619_v40 }
0x17b2   :  { %1622 = vst [vmem:[#allocation10 + $0xe] sm:$0x3] %v1620_v47 }
0x17b3   :  { %2253 = shalt.err (!%p2250_p1)
}
0x17b4   :  { %1640 = dma.vmem_to_hbm [thread:$0]  %s1635_s28, 256, %s2757_s5, [#allocation4], %s2274_s29, %s2274_s29, %s2275_s30  }
0x17b5   :  { %2268 = dma.done.wait [#allocation4], 256  }
0x17b6   :  { %2269 = vsyncadd [#allocation4], 4294967040 }
0x17b7   :  { %2270 = dma.done.wait [#allocation12], 32  }
0x17b8   :  { %2271 = vsyncadd [#allocation12], 4294967264 }
0x17b9   :  { %1657 = vsyncpa [#allocation3], 1 }
0x17ba   :  { %1658 = vsyncpa [#allocation6], 1 }
0x17bb   :  { %1659 = vsyncpa [#allocation9], 1 }
0x17bc   :  { %1660 = vsyncpa [#allocation4], 1 }
0x17bd   :  { %1661 = vsyncpa [#allocation12], 1 }

</bundles_post_ra>
